<compile_context>
chip_gen: v7x
topology: tpu7x:2x2x1
jax: 0.10.0
libtpu: 0.0.40
codegen_flags: <defaults>
</compile_context>

<pallas_src>
import functools

import jax
import jax.numpy as jnp
from jax.experimental import pallas as pl
from jax.experimental.pallas import tpu as pltpu


_OFFSETS = tuple((dy, dx) for dy in (-1, 0, 1) for dx in (-1, 0, 1))


# ---------------------------------------------------------------------------
# Fused Pallas kernel: one grid step == one sample of the flattened batch.
# ---------------------------------------------------------------------------
def _fused_kernel(feat_ref, filt_ref, mask_ref,
                  w0, p0, w1, p1, w2, p2, w3, p3,
                  wbb_ref, bbb_ref, o_ref, *, H, W):
    HW = H * W

    def conv3x3(x, w):
        # x: (Cin, H*W) value; w: (Cout, 9*Cin) value  ->  (Cout, H*W)
        pieces = []
        for k, (dy, dx) in enumerate(_OFFSETS):
            if dy == 0 and dx == 0:
                pieces.append(x)                           # center tap: no shift / mask
                continue
            s = dy * W + dx
            r = pltpu.roll(x, shift=(-s) % HW, axis=1)     # XLU lane roll: r[:, i] = x[:, i+s]
            pieces.append(r * mask_ref[k:k + 1, :])        # zero the padded halo taps
        patches = jnp.concatenate(pieces, axis=0)          # (9*Cin, H*W), lane-dense
        return jnp.dot(w, patches, preferred_element_type=jnp.float32)

    # ---- attention: <feat, filter_proj> over channels, then rescale feat ----
    x = feat_ref[0]                                         # (C, H*W)
    f = filt_ref[0]                                         # (1, C)
    att = jnp.dot(f, x, preferred_element_type=jnp.float32)  # (1, H*W)
    x = att * x                                             # feats_att (C, H*W)

    # ---- tower: 4 x (conv3x3 -> GroupNorm(1 group) -> ReLU), unrolled ----
    for w_ref, p_ref in ((w0, p0), (w1, p1), (w2, p2), (w3, p3)):
        p = p_ref[...]                                      # (Cout, 3): bias | gamma | beta
        y = conv3x3(x, w_ref[...]) + p[:, 0:1]
        mean = jnp.mean(y, keepdims=True)                   # over all C*H*W of this sample
        var = jnp.mean(jnp.square(y - mean), keepdims=True)
        scale = p[:, 1:2] * jax.lax.rsqrt(var + 1e-5)       # gamma * inv_std   (Cout, 1)
        shift = p[:, 2:3] - mean * scale                    # beta - mean*scale (Cout, 1)
        x = jnp.maximum(y * scale + shift, 0.0)             # GN affine + ReLU, 2 VALU passes

    # ---- bbreg head: conv3x3 -> exp ----
    y = conv3x3(x, wbb_ref[...]) + bbb_ref[...]             # (4, H*W)
    o_ref[0] = jnp.exp(y)


# ---------------------------------------------------------------------------
# Wrapper helpers
# ---------------------------------------------------------------------------
def _flatten_conv_w(w_oihw):
    # (Cout, Cin, 3, 3) OIHW -> (Cout, 9*Cin) ordered to match _OFFSETS / im2col rows.
    co, ci = w_oihw.shape[0], w_oihw.shape[1]
    return jnp.transpose(w_oihw, (0, 2, 3, 1)).reshape(co, 9 * ci)


def _halo_masks(H, W):
    # (9, H*W) float mask: 1 where the (dy,dx) neighbour is inside the image, else 0.
    HW = H * W
    yy, xx = jnp.meshgrid(jnp.arange(H), jnp.arange(W), indexing="ij")
    rows = []
    for dy, dx in _OFFSETS:
        m = (yy + dy >= 0) & (yy + dy < H) & (xx + dx >= 0) & (xx + dx < W)
        rows.append(m.reshape(1, HW))
    return jnp.concatenate(rows, axis=0).astype(jnp.float32)


# ---------------------------------------------------------------------------
# Forward
# ---------------------------------------------------------------------------
@jax.jit
def dense_box_regressor_forward(feat, filt, params):
    nf, ns, C, H, W = feat.shape
    B = nf * ns
    HW = H * W

    # Filter projection Linear(C, C): tiny (ns x C) matmul -> plain XLA.
    filter_proj = (jnp.dot(filt.reshape(ns, C).astype(jnp.float32),
                           params["linear_w"]) + params["linear_b"])        # (ns, C)
    filt_s = filter_proj.reshape(ns, 1, C)                                  # indexed by b % ns

    # (nf, ns, C, H, W) -> (B, C, H*W): pure reshape, keeps NCHW channel-major.
    feat_r = feat.reshape(B, C, HW).astype(jnp.float32)

    # Precompute halo masks once (shared by all 5 convs, constant across the grid).
    mask = _halo_masks(H, W)                                                # (9, HW)

    # Kernel-friendly constant weight layouts (done once under jit).
    tower_args, tower_specs = [], []
    for (w, b, g, be) in params["tower"]:
        wf = _flatten_conv_w(w)                                             # (Cout, 9*Cin)
        pk = jnp.stack([b, g, be], axis=1)                                  # (Cout, 3)
        tower_args += [wf, pk]
        tower_specs += [pl.BlockSpec(wf.shape, lambda b_: (0, 0)),
                        pl.BlockSpec(pk.shape, lambda b_: (0, 0))]
    wbb = _flatten_conv_w(params["bbreg_w"])                                # (4, 9*hidden)
    bbb = params["bbreg_b"].reshape(4, 1)

    out = pl.pallas_call(
        functools.partial(_fused_kernel, H=H, W=W),
        out_shape=jax.ShapeDtypeStruct((B, 4, HW), jnp.float32),
        grid=(B,),
        in_specs=[
            pl.BlockSpec((1, C, HW), lambda b_: (b_, 0, 0)),
            pl.BlockSpec((1, 1, C), lambda b_: (b_ % ns, 0, 0)),            # per-sequence filter
            pl.BlockSpec(mask.shape, lambda b_: (0, 0)),
            *tower_specs,
            pl.BlockSpec(wbb.shape, lambda b_: (0, 0)),
            pl.BlockSpec(bbb.shape, lambda b_: (0, 0)),
        ],
        out_specs=pl.BlockSpec((1, 4, HW), lambda b_: (b_, 0, 0)),
        compiler_params=pltpu.CompilerParams(dimension_semantics=("parallel",)),
    )(feat_r, filt_s, mask, *tower_args, wbb, bbb)

    # (B, 4, H*W) -> (1, nf*ns, 4, H, W): pure reshape, already NCHW-ordered.
    return out.reshape(B, 4, H, W)[None]


# ---------------------------------------------------------------------------
# Parameter construction (deterministic, synthetic)
# ---------------------------------------------------------------------------
def init_params(key, num_channels):
    hidden = num_channels // 4
    keys = jax.random.split(key, 32)
    k = iter(range(32))
    s = 0.05
    params = {}
    # nn.Linear(C, C): weight stored pre-transposed to (in, out).
    params["linear_w"] = s * jax.random.normal(keys[next(k)], (num_channels, num_channels), jnp.float32)
    params["linear_b"] = s * jax.random.normal(keys[next(k)], (num_channels,), jnp.float32)
    tower = []
    cin = num_channels
    for _ in range(4):
        w = s * jax.random.normal(keys[next(k)], (hidden, cin, 3, 3), jnp.float32)   # OIHW
        b = s * jax.random.normal(keys[next(k)], (hidden,), jnp.float32)
        gamma = 1.0 + 0.1 * jax.random.normal(keys[next(k)], (hidden,), jnp.float32)
        beta = 0.1 * jax.random.normal(keys[next(k)], (hidden,), jnp.float32)
        tower.append((w, b, gamma, beta))
        cin = hidden
    params["tower"] = tower
    params["bbreg_w"] = s * jax.random.normal(keys[next(k)], (4, hidden, 3, 3), jnp.float32)
    params["bbreg_b"] = s * jax.random.normal(keys[next(k)], (4,), jnp.float32)
    return params


# ---------------------------------------------------------------------------
if __name__ == "__main__":
    nf, ns = 2, 2
    num_channels, H, W = 32, 16, 16

    key = jax.random.PRNGKey(0)
    k_feat, k_filt, k_par = jax.random.split(key, 3)
    feat = jax.random.normal(k_feat, (nf, ns, num_channels, H, W), jnp.float32)
    filt = jax.random.normal(k_filt, (ns, num_channels, 1, 1), jnp.float32)
    params = init_params(k_par, num_channels)

    ltrb = dense_box_regressor_forward(feat, filt, params)
    ltrb = jax.block_until_ready(ltrb)

    assert ltrb.shape == (1, nf * ns, 4, H, W), ltrb.shape
    assert bool(jnp.all(ltrb > 0)) and bool(jnp.all(jnp.isfinite(ltrb)))
    print("KERNEL_OK")
</pallas_src>

<mosaic_0001>
module attributes {stable_mosaic.version = 11 : i64} {
  func.func @_fused_kernel(%arg0: i32, %arg1: memref<1x32x256xf32, #tpu.memory_space<vmem>>, %arg2: memref<1x1x32xf32, #tpu.memory_space<vmem>>, %arg3: memref<9x256xf32, #tpu.memory_space<vmem>>, %arg4: memref<8x288xf32, #tpu.memory_space<vmem>>, %arg5: memref<8x3xf32, #tpu.memory_space<vmem>>, %arg6: memref<8x72xf32, #tpu.memory_space<vmem>>, %arg7: memref<8x3xf32, #tpu.memory_space<vmem>>, %arg8: memref<8x72xf32, #tpu.memory_space<vmem>>, %arg9: memref<8x3xf32, #tpu.memory_space<vmem>>, %arg10: memref<8x72xf32, #tpu.memory_space<vmem>>, %arg11: memref<8x3xf32, #tpu.memory_space<vmem>>, %arg12: memref<4x72xf32, #tpu.memory_space<vmem>>, %arg13: memref<4x1xf32, #tpu.memory_space<vmem>>, %arg14: memref<1x4x256xf32, #tpu.memory_space<vmem>>) attributes {dimension_semantics = [#tpu.dimension_semantics<parallel>], iteration_bounds = array<i64: 4>, scalar_prefetch = 0 : i64, scratch_operands = 0 : i64, tpu.core_type = #tpu.core_type<tc>, window_params = [{transform_indices = @transform_0, window_bounds = array<i64: 1, 32, 256>}, {transform_indices = @transform_1, window_bounds = array<i64: 1, 1, 32>}, {pipeline_mode = #tpu.pipeline_mode<synchronous>, transform_indices = @transform_2, window_bounds = array<i64: 9, 256>}, {pipeline_mode = #tpu.pipeline_mode<synchronous>, transform_indices = @transform_3, window_bounds = array<i64: 8, 288>}, {pipeline_mode = #tpu.pipeline_mode<synchronous>, transform_indices = @transform_4, window_bounds = array<i64: 8, 3>}, {pipeline_mode = #tpu.pipeline_mode<synchronous>, transform_indices = @transform_5, window_bounds = array<i64: 8, 72>}, {pipeline_mode = #tpu.pipeline_mode<synchronous>, transform_indices = @transform_6, window_bounds = array<i64: 8, 3>}, {pipeline_mode = #tpu.pipeline_mode<synchronous>, transform_indices = @transform_7, window_bounds = array<i64: 8, 72>}, {pipeline_mode = #tpu.pipeline_mode<synchronous>, transform_indices = @transform_8, window_bounds = array<i64: 8, 3>}, {pipeline_mode = #tpu.pipeline_mode<synchronous>, transform_indices = @transform_9, window_bounds = array<i64: 8, 72>}, {pipeline_mode = #tpu.pipeline_mode<synchronous>, transform_indices = @transform_10, window_bounds = array<i64: 8, 3>}, {pipeline_mode = #tpu.pipeline_mode<synchronous>, transform_indices = @transform_11, window_bounds = array<i64: 4, 72>}, {pipeline_mode = #tpu.pipeline_mode<synchronous>, transform_indices = @transform_12, window_bounds = array<i64: 4, 1>}, {transform_indices = @transform_13, window_bounds = array<i64: 1, 4, 256>}]} {
    %c0 = arith.constant 0 : index
    %c0_0 = arith.constant 0 : index
    %c0_1 = arith.constant 0 : index
    %0 = vector.load %arg1[%c0, %c0_0, %c0_1] : memref<1x32x256xf32, #tpu.memory_space<vmem>>, vector<1x32x256xf32>
    %1 = vector.shape_cast %0 : vector<1x32x256xf32> to vector<32x256xf32>
    %c0_2 = arith.constant 0 : index
    %c0_3 = arith.constant 0 : index
    %c0_4 = arith.constant 0 : index
    %2 = vector.load %arg2[%c0_2, %c0_3, %c0_4] : memref<1x1x32xf32, #tpu.memory_space<vmem>>, vector<1x1x32xf32>
    %3 = vector.shape_cast %2 : vector<1x1x32xf32> to vector<1x32xf32>
    %cst = arith.constant dense<0.000000e+00> : vector<1x256xf32>
    %4 = tpu.matmul %3, %1, %cst {dimension_numbers = #tpu.dot_dimension_numbers<[1], [0], [0], [1], [0, 0, 1, 1], [], []>} : vector<1x32xf32>, vector<32x256xf32>, vector<1x256xf32> -> vector<1x256xf32>
    %5 = vector.broadcast %4 : vector<1x256xf32> to vector<32x256xf32>
    %6 = arith.mulf %5, %1 : vector<32x256xf32>
    %c0_5 = arith.constant 0 : index
    %c0_6 = arith.constant 0 : index
    %7 = vector.load %arg5[%c0_5, %c0_6] : memref<8x3xf32, #tpu.memory_space<vmem>>, vector<8x3xf32>
    %c0_7 = arith.constant 0 : index
    %c0_8 = arith.constant 0 : index
    %8 = vector.load %arg4[%c0_7, %c0_8] : memref<8x288xf32, #tpu.memory_space<vmem>>, vector<8x288xf32>
    %c17_i32 = arith.constant 17 : i32
    %9 = tpu.dynamic_rotate %6 by %c17_i32 dim 1 : vector<32x256xf32>, i32 -> vector<32x256xf32>
    %c0_9 = arith.constant 0 : index
    %c0_10 = arith.constant 0 : index
    %10 = vector.load %arg3[%c0_9, %c0_10] : memref<9x256xf32, #tpu.memory_space<vmem>>, vector<1x256xf32>
    %11 = vector.broadcast %10 : vector<1x256xf32> to vector<32x256xf32>
    %12 = arith.mulf %9, %11 : vector<32x256xf32>
    %c16_i32 = arith.constant 16 : i32
    %13 = tpu.dynamic_rotate %6 by %c16_i32 dim 1 : vector<32x256xf32>, i32 -> vector<32x256xf32>
    %c1 = arith.constant 1 : index
    %c0_11 = arith.constant 0 : index
    %14 = vector.load %arg3[%c1, %c0_11] : memref<9x256xf32, #tpu.memory_space<vmem>>, vector<1x256xf32>
    %15 = vector.broadcast %14 : vector<1x256xf32> to vector<32x256xf32>
    %16 = arith.mulf %13, %15 : vector<32x256xf32>
    %c15_i32 = arith.constant 15 : i32
    %17 = tpu.dynamic_rotate %6 by %c15_i32 dim 1 : vector<32x256xf32>, i32 -> vector<32x256xf32>
    %c2 = arith.constant 2 : index
    %c0_12 = arith.constant 0 : index
    %18 = vector.load %arg3[%c2, %c0_12] : memref<9x256xf32, #tpu.memory_space<vmem>>, vector<1x256xf32>
    %19 = vector.broadcast %18 : vector<1x256xf32> to vector<32x256xf32>
    %20 = arith.mulf %17, %19 : vector<32x256xf32>
    %c1_i32 = arith.constant 1 : i32
    %21 = tpu.dynamic_rotate %6 by %c1_i32 dim 1 : vector<32x256xf32>, i32 -> vector<32x256xf32>
    %c3 = arith.constant 3 : index
    %c0_13 = arith.constant 0 : index
    %22 = vector.load %arg3[%c3, %c0_13] : memref<9x256xf32, #tpu.memory_space<vmem>>, vector<1x256xf32>
    %23 = vector.broadcast %22 : vector<1x256xf32> to vector<32x256xf32>
    %24 = arith.mulf %21, %23 : vector<32x256xf32>
    %c255_i32 = arith.constant 255 : i32
    %25 = tpu.dynamic_rotate %6 by %c255_i32 dim 1 : vector<32x256xf32>, i32 -> vector<32x256xf32>
    %c5 = arith.constant 5 : index
    %c0_14 = arith.constant 0 : index
    %26 = vector.load %arg3[%c5, %c0_14] : memref<9x256xf32, #tpu.memory_space<vmem>>, vector<1x256xf32>
    %27 = vector.broadcast %26 : vector<1x256xf32> to vector<32x256xf32>
    %28 = arith.mulf %25, %27 : vector<32x256xf32>
    %c241_i32 = arith.constant 241 : i32
    %29 = tpu.dynamic_rotate %6 by %c241_i32 dim 1 : vector<32x256xf32>, i32 -> vector<32x256xf32>
    %c6 = arith.constant 6 : index
    %c0_15 = arith.constant 0 : index
    %30 = vector.load %arg3[%c6, %c0_15] : memref<9x256xf32, #tpu.memory_space<vmem>>, vector<1x256xf32>
    %31 = vector.broadcast %30 : vector<1x256xf32> to vector<32x256xf32>
    %32 = arith.mulf %29, %31 : vector<32x256xf32>
    %c240_i32 = arith.constant 240 : i32
    %33 = tpu.dynamic_rotate %6 by %c240_i32 dim 1 : vector<32x256xf32>, i32 -> vector<32x256xf32>
    %c7 = arith.constant 7 : index
    %c0_16 = arith.constant 0 : index
    %34 = vector.load %arg3[%c7, %c0_16] : memref<9x256xf32, #tpu.memory_space<vmem>>, vector<1x256xf32>
    %35 = vector.broadcast %34 : vector<1x256xf32> to vector<32x256xf32>
    %36 = arith.mulf %33, %35 : vector<32x256xf32>
    %c239_i32 = arith.constant 239 : i32
    %37 = tpu.dynamic_rotate %6 by %c239_i32 dim 1 : vector<32x256xf32>, i32 -> vector<32x256xf32>
    %c8 = arith.constant 8 : index
    %c0_17 = arith.constant 0 : index
    %38 = vector.load %arg3[%c8, %c0_17] : memref<9x256xf32, #tpu.memory_space<vmem>>, vector<1x256xf32>
    %39 = vector.broadcast %38 : vector<1x256xf32> to vector<32x256xf32>
    %40 = arith.mulf %37, %39 : vector<32x256xf32>
    %41 = tpu.concatenate %12, %16, %20, %24, %6, %28, %32, %36, %40 in 0 : vector<32x256xf32>, vector<32x256xf32>, vector<32x256xf32>, vector<32x256xf32>, vector<32x256xf32>, vector<32x256xf32>, vector<32x256xf32>, vector<32x256xf32>, vector<32x256xf32> -> vector<288x256xf32>
    %cst_18 = arith.constant dense<0.000000e+00> : vector<8x256xf32>
    %42 = tpu.matmul %8, %41, %cst_18 {dimension_numbers = #tpu.dot_dimension_numbers<[1], [0], [0], [1], [0, 0, 1, 1], [], []>} : vector<8x288xf32>, vector<288x256xf32>, vector<8x256xf32> -> vector<8x256xf32>
    %43 = vector.extract_strided_slice %7 {offsets = [0, 0], sizes = [8, 1], strides = [1, 1]} : vector<8x3xf32> to vector<8x1xf32>
    %44 = vector.broadcast %43 : vector<8x1xf32> to vector<8x256xf32>
    %45 = arith.addf %42, %44 : vector<8x256xf32>
    %46 = vector.shape_cast %45 : vector<8x256xf32> to vector<1x8x256xf32>
    %cst_19 = arith.constant dense<0.000000e+00> : vector<1xf32>
    %47 = vector.multi_reduction <add>, %46, %cst_19 [1, 2] : vector<1x8x256xf32> to vector<1xf32>
    %48 = vector.shape_cast %47 : vector<1xf32> to vector<1x1x1xf32>
    %49 = vector.extract %48[0, 0, 0] : f32 from vector<1x1x1xf32>
    %50 = vector.broadcast %49 : f32 to vector<1x1xf32>
    %cst_20 = arith.constant 2.048000e+03 : f32
    %51 = vector.broadcast %cst_20 : f32 to vector<1x1xf32>
    %52 = arith.divf %50, %51 : vector<1x1xf32>
    %53 = vector.broadcast %52 : vector<1x1xf32> to vector<8x256xf32>
    %54 = arith.subf %45, %53 : vector<8x256xf32>
    %55 = arith.mulf %54, %54 : vector<8x256xf32>
    %56 = vector.shape_cast %55 : vector<8x256xf32> to vector<1x8x256xf32>
    %cst_21 = arith.constant dense<0.000000e+00> : vector<1xf32>
    %57 = vector.multi_reduction <add>, %56, %cst_21 [1, 2] : vector<1x8x256xf32> to vector<1xf32>
    %58 = vector.shape_cast %57 : vector<1xf32> to vector<1x1x1xf32>
    %59 = vector.extract %58[0, 0, 0] : f32 from vector<1x1x1xf32>
    %60 = vector.broadcast %59 : f32 to vector<1x1xf32>
    %cst_22 = arith.constant 2.048000e+03 : f32
    %61 = vector.broadcast %cst_22 : f32 to vector<1x1xf32>
    %62 = arith.divf %60, %61 : vector<1x1xf32>
    %63 = vector.extract_strided_slice %7 {offsets = [0, 1], sizes = [8, 1], strides = [1, 1]} : vector<8x3xf32> to vector<8x1xf32>
    %cst_23 = arith.constant 9.99999974E-6 : f32
    %64 = vector.broadcast %cst_23 : f32 to vector<1x1xf32>
    %65 = arith.addf %62, %64 : vector<1x1xf32>
    %66 = math.rsqrt %65 : vector<1x1xf32>
    %67 = vector.broadcast %66 : vector<1x1xf32> to vector<8x1xf32>
    %68 = arith.mulf %63, %67 : vector<8x1xf32>
    %69 = vector.extract_strided_slice %7 {offsets = [0, 2], sizes = [8, 1], strides = [1, 1]} : vector<8x3xf32> to vector<8x1xf32>
    %70 = vector.broadcast %52 : vector<1x1xf32> to vector<8x1xf32>
    %71 = arith.mulf %70, %68 : vector<8x1xf32>
    %72 = arith.subf %69, %71 : vector<8x1xf32>
    %73 = vector.broadcast %68 : vector<8x1xf32> to vector<8x256xf32>
    %74 = arith.mulf %45, %73 : vector<8x256xf32>
    %75 = vector.broadcast %72 : vector<8x1xf32> to vector<8x256xf32>
    %76 = arith.addf %74, %75 : vector<8x256xf32>
    %cst_24 = arith.constant 0.000000e+00 : f32
    %77 = vector.broadcast %cst_24 : f32 to vector<8x256xf32>
    %78 = arith.maximumf %76, %77 : vector<8x256xf32>
    %c0_25 = arith.constant 0 : index
    %c0_26 = arith.constant 0 : index
    %79 = vector.load %arg7[%c0_25, %c0_26] : memref<8x3xf32, #tpu.memory_space<vmem>>, vector<8x3xf32>
    %c0_27 = arith.constant 0 : index
    %c0_28 = arith.constant 0 : index
    %80 = vector.load %arg6[%c0_27, %c0_28] : memref<8x72xf32, #tpu.memory_space<vmem>>, vector<8x72xf32>
    %c17_i32_29 = arith.constant 17 : i32
    %81 = tpu.dynamic_rotate %78 by %c17_i32_29 dim 1 : vector<8x256xf32>, i32 -> vector<8x256xf32>
    %c0_30 = arith.constant 0 : index
    %c0_31 = arith.constant 0 : index
    %82 = vector.load %arg3[%c0_30, %c0_31] : memref<9x256xf32, #tpu.memory_space<vmem>>, vector<1x256xf32>
    %83 = vector.broadcast %82 : vector<1x256xf32> to vector<8x256xf32>
    %84 = arith.mulf %81, %83 : vector<8x256xf32>
    %c16_i32_32 = arith.constant 16 : i32
    %85 = tpu.dynamic_rotate %78 by %c16_i32_32 dim 1 : vector<8x256xf32>, i32 -> vector<8x256xf32>
    %c1_33 = arith.constant 1 : index
    %c0_34 = arith.constant 0 : index
    %86 = vector.load %arg3[%c1_33, %c0_34] : memref<9x256xf32, #tpu.memory_space<vmem>>, vector<1x256xf32>
    %87 = vector.broadcast %86 : vector<1x256xf32> to vector<8x256xf32>
    %88 = arith.mulf %85, %87 : vector<8x256xf32>
    %c15_i32_35 = arith.constant 15 : i32
    %89 = tpu.dynamic_rotate %78 by %c15_i32_35 dim 1 : vector<8x256xf32>, i32 -> vector<8x256xf32>
    %c2_36 = arith.constant 2 : index
    %c0_37 = arith.constant 0 : index
    %90 = vector.load %arg3[%c2_36, %c0_37] : memref<9x256xf32, #tpu.memory_space<vmem>>, vector<1x256xf32>
    %91 = vector.broadcast %90 : vector<1x256xf32> to vector<8x256xf32>
    %92 = arith.mulf %89, %91 : vector<8x256xf32>
    %c1_i32_38 = arith.constant 1 : i32
    %93 = tpu.dynamic_rotate %78 by %c1_i32_38 dim 1 : vector<8x256xf32>, i32 -> vector<8x256xf32>
    %c3_39 = arith.constant 3 : index
    %c0_40 = arith.constant 0 : index
    %94 = vector.load %arg3[%c3_39, %c0_40] : memref<9x256xf32, #tpu.memory_space<vmem>>, vector<1x256xf32>
    %95 = vector.broadcast %94 : vector<1x256xf32> to vector<8x256xf32>
    %96 = arith.mulf %93, %95 : vector<8x256xf32>
    %c255_i32_41 = arith.constant 255 : i32
    %97 = tpu.dynamic_rotate %78 by %c255_i32_41 dim 1 : vector<8x256xf32>, i32 -> vector<8x256xf32>
    %c5_42 = arith.constant 5 : index
    %c0_43 = arith.constant 0 : index
    %98 = vector.load %arg3[%c5_42, %c0_43] : memref<9x256xf32, #tpu.memory_space<vmem>>, vector<1x256xf32>
    %99 = vector.broadcast %98 : vector<1x256xf32> to vector<8x256xf32>
    %100 = arith.mulf %97, %99 : vector<8x256xf32>
    %c241_i32_44 = arith.constant 241 : i32
    %101 = tpu.dynamic_rotate %78 by %c241_i32_44 dim 1 : vector<8x256xf32>, i32 -> vector<8x256xf32>
    %c6_45 = arith.constant 6 : index
    %c0_46 = arith.constant 0 : index
    %102 = vector.load %arg3[%c6_45, %c0_46] : memref<9x256xf32, #tpu.memory_space<vmem>>, vector<1x256xf32>
    %103 = vector.broadcast %102 : vector<1x256xf32> to vector<8x256xf32>
    %104 = arith.mulf %101, %103 : vector<8x256xf32>
    %c240_i32_47 = arith.constant 240 : i32
    %105 = tpu.dynamic_rotate %78 by %c240_i32_47 dim 1 : vector<8x256xf32>, i32 -> vector<8x256xf32>
    %c7_48 = arith.constant 7 : index
    %c0_49 = arith.constant 0 : index
    %106 = vector.load %arg3[%c7_48, %c0_49] : memref<9x256xf32, #tpu.memory_space<vmem>>, vector<1x256xf32>
    %107 = vector.broadcast %106 : vector<1x256xf32> to vector<8x256xf32>
    %108 = arith.mulf %105, %107 : vector<8x256xf32>
    %c239_i32_50 = arith.constant 239 : i32
    %109 = tpu.dynamic_rotate %78 by %c239_i32_50 dim 1 : vector<8x256xf32>, i32 -> vector<8x256xf32>
    %c8_51 = arith.constant 8 : index
    %c0_52 = arith.constant 0 : index
    %110 = vector.load %arg3[%c8_51, %c0_52] : memref<9x256xf32, #tpu.memory_space<vmem>>, vector<1x256xf32>
    %111 = vector.broadcast %110 : vector<1x256xf32> to vector<8x256xf32>
    %112 = arith.mulf %109, %111 : vector<8x256xf32>
    %113 = tpu.concatenate %84, %88, %92, %96, %78, %100, %104, %108, %112 in 0 : vector<8x256xf32>, vector<8x256xf32>, vector<8x256xf32>, vector<8x256xf32>, vector<8x256xf32>, vector<8x256xf32>, vector<8x256xf32>, vector<8x256xf32>, vector<8x256xf32> -> vector<72x256xf32>
    %cst_53 = arith.constant dense<0.000000e+00> : vector<8x256xf32>
    %114 = tpu.matmul %80, %113, %cst_53 {dimension_numbers = #tpu.dot_dimension_numbers<[1], [0], [0], [1], [0, 0, 1, 1], [], []>} : vector<8x72xf32>, vector<72x256xf32>, vector<8x256xf32> -> vector<8x256xf32>
    %115 = vector.extract_strided_slice %79 {offsets = [0, 0], sizes = [8, 1], strides = [1, 1]} : vector<8x3xf32> to vector<8x1xf32>
    %116 = vector.broadcast %115 : vector<8x1xf32> to vector<8x256xf32>
    %117 = arith.addf %114, %116 : vector<8x256xf32>
    %118 = vector.shape_cast %117 : vector<8x256xf32> to vector<1x8x256xf32>
    %cst_54 = arith.constant dense<0.000000e+00> : vector<1xf32>
    %119 = vector.multi_reduction <add>, %118, %cst_54 [1, 2] : vector<1x8x256xf32> to vector<1xf32>
    %120 = vector.shape_cast %119 : vector<1xf32> to vector<1x1x1xf32>
    %121 = vector.extract %120[0, 0, 0] : f32 from vector<1x1x1xf32>
    %122 = vector.broadcast %121 : f32 to vector<1x1xf32>
    %cst_55 = arith.constant 2.048000e+03 : f32
    %123 = vector.broadcast %cst_55 : f32 to vector<1x1xf32>
    %124 = arith.divf %122, %123 : vector<1x1xf32>
    %125 = vector.broadcast %124 : vector<1x1xf32> to vector<8x256xf32>
    %126 = arith.subf %117, %125 : vector<8x256xf32>
    %127 = arith.mulf %126, %126 : vector<8x256xf32>
    %128 = vector.shape_cast %127 : vector<8x256xf32> to vector<1x8x256xf32>
    %cst_56 = arith.constant dense<0.000000e+00> : vector<1xf32>
    %129 = vector.multi_reduction <add>, %128, %cst_56 [1, 2] : vector<1x8x256xf32> to vector<1xf32>
    %130 = vector.shape_cast %129 : vector<1xf32> to vector<1x1x1xf32>
    %131 = vector.extract %130[0, 0, 0] : f32 from vector<1x1x1xf32>
    %132 = vector.broadcast %131 : f32 to vector<1x1xf32>
    %cst_57 = arith.constant 2.048000e+03 : f32
    %133 = vector.broadcast %cst_57 : f32 to vector<1x1xf32>
    %134 = arith.divf %132, %133 : vector<1x1xf32>
    %135 = vector.extract_strided_slice %79 {offsets = [0, 1], sizes = [8, 1], strides = [1, 1]} : vector<8x3xf32> to vector<8x1xf32>
    %cst_58 = arith.constant 9.99999974E-6 : f32
    %136 = vector.broadcast %cst_58 : f32 to vector<1x1xf32>
    %137 = arith.addf %134, %136 : vector<1x1xf32>
    %138 = math.rsqrt %137 : vector<1x1xf32>
    %139 = vector.broadcast %138 : vector<1x1xf32> to vector<8x1xf32>
    %140 = arith.mulf %135, %139 : vector<8x1xf32>
    %141 = vector.extract_strided_slice %79 {offsets = [0, 2], sizes = [8, 1], strides = [1, 1]} : vector<8x3xf32> to vector<8x1xf32>
    %142 = vector.broadcast %124 : vector<1x1xf32> to vector<8x1xf32>
    %143 = arith.mulf %142, %140 : vector<8x1xf32>
    %144 = arith.subf %141, %143 : vector<8x1xf32>
    %145 = vector.broadcast %140 : vector<8x1xf32> to vector<8x256xf32>
    %146 = arith.mulf %117, %145 : vector<8x256xf32>
    %147 = vector.broadcast %144 : vector<8x1xf32> to vector<8x256xf32>
    %148 = arith.addf %146, %147 : vector<8x256xf32>
    %cst_59 = arith.constant 0.000000e+00 : f32
    %149 = vector.broadcast %cst_59 : f32 to vector<8x256xf32>
    %150 = arith.maximumf %148, %149 : vector<8x256xf32>
    %c0_60 = arith.constant 0 : index
    %c0_61 = arith.constant 0 : index
    %151 = vector.load %arg9[%c0_60, %c0_61] : memref<8x3xf32, #tpu.memory_space<vmem>>, vector<8x3xf32>
    %c0_62 = arith.constant 0 : index
    %c0_63 = arith.constant 0 : index
    %152 = vector.load %arg8[%c0_62, %c0_63] : memref<8x72xf32, #tpu.memory_space<vmem>>, vector<8x72xf32>
    %c17_i32_64 = arith.constant 17 : i32
    %153 = tpu.dynamic_rotate %150 by %c17_i32_64 dim 1 : vector<8x256xf32>, i32 -> vector<8x256xf32>
    %c0_65 = arith.constant 0 : index
    %c0_66 = arith.constant 0 : index
    %154 = vector.load %arg3[%c0_65, %c0_66] : memref<9x256xf32, #tpu.memory_space<vmem>>, vector<1x256xf32>
    %155 = vector.broadcast %154 : vector<1x256xf32> to vector<8x256xf32>
    %156 = arith.mulf %153, %155 : vector<8x256xf32>
    %c16_i32_67 = arith.constant 16 : i32
    %157 = tpu.dynamic_rotate %150 by %c16_i32_67 dim 1 : vector<8x256xf32>, i32 -> vector<8x256xf32>
    %c1_68 = arith.constant 1 : index
    %c0_69 = arith.constant 0 : index
    %158 = vector.load %arg3[%c1_68, %c0_69] : memref<9x256xf32, #tpu.memory_space<vmem>>, vector<1x256xf32>
    %159 = vector.broadcast %158 : vector<1x256xf32> to vector<8x256xf32>
    %160 = arith.mulf %157, %159 : vector<8x256xf32>
    %c15_i32_70 = arith.constant 15 : i32
    %161 = tpu.dynamic_rotate %150 by %c15_i32_70 dim 1 : vector<8x256xf32>, i32 -> vector<8x256xf32>
    %c2_71 = arith.constant 2 : index
    %c0_72 = arith.constant 0 : index
    %162 = vector.load %arg3[%c2_71, %c0_72] : memref<9x256xf32, #tpu.memory_space<vmem>>, vector<1x256xf32>
    %163 = vector.broadcast %162 : vector<1x256xf32> to vector<8x256xf32>
    %164 = arith.mulf %161, %163 : vector<8x256xf32>
    %c1_i32_73 = arith.constant 1 : i32
    %165 = tpu.dynamic_rotate %150 by %c1_i32_73 dim 1 : vector<8x256xf32>, i32 -> vector<8x256xf32>
    %c3_74 = arith.constant 3 : index
    %c0_75 = arith.constant 0 : index
    %166 = vector.load %arg3[%c3_74, %c0_75] : memref<9x256xf32, #tpu.memory_space<vmem>>, vector<1x256xf32>
    %167 = vector.broadcast %166 : vector<1x256xf32> to vector<8x256xf32>
    %168 = arith.mulf %165, %167 : vector<8x256xf32>
    %c255_i32_76 = arith.constant 255 : i32
    %169 = tpu.dynamic_rotate %150 by %c255_i32_76 dim 1 : vector<8x256xf32>, i32 -> vector<8x256xf32>
    %c5_77 = arith.constant 5 : index
    %c0_78 = arith.constant 0 : index
    %170 = vector.load %arg3[%c5_77, %c0_78] : memref<9x256xf32, #tpu.memory_space<vmem>>, vector<1x256xf32>
    %171 = vector.broadcast %170 : vector<1x256xf32> to vector<8x256xf32>
    %172 = arith.mulf %169, %171 : vector<8x256xf32>
    %c241_i32_79 = arith.constant 241 : i32
    %173 = tpu.dynamic_rotate %150 by %c241_i32_79 dim 1 : vector<8x256xf32>, i32 -> vector<8x256xf32>
    %c6_80 = arith.constant 6 : index
    %c0_81 = arith.constant 0 : index
    %174 = vector.load %arg3[%c6_80, %c0_81] : memref<9x256xf32, #tpu.memory_space<vmem>>, vector<1x256xf32>
    %175 = vector.broadcast %174 : vector<1x256xf32> to vector<8x256xf32>
    %176 = arith.mulf %173, %175 : vector<8x256xf32>
    %c240_i32_82 = arith.constant 240 : i32
    %177 = tpu.dynamic_rotate %150 by %c240_i32_82 dim 1 : vector<8x256xf32>, i32 -> vector<8x256xf32>
    %c7_83 = arith.constant 7 : index
    %c0_84 = arith.constant 0 : index
    %178 = vector.load %arg3[%c7_83, %c0_84] : memref<9x256xf32, #tpu.memory_space<vmem>>, vector<1x256xf32>
    %179 = vector.broadcast %178 : vector<1x256xf32> to vector<8x256xf32>
    %180 = arith.mulf %177, %179 : vector<8x256xf32>
    %c239_i32_85 = arith.constant 239 : i32
    %181 = tpu.dynamic_rotate %150 by %c239_i32_85 dim 1 : vector<8x256xf32>, i32 -> vector<8x256xf32>
    %c8_86 = arith.constant 8 : index
    %c0_87 = arith.constant 0 : index
    %182 = vector.load %arg3[%c8_86, %c0_87] : memref<9x256xf32, #tpu.memory_space<vmem>>, vector<1x256xf32>
    %183 = vector.broadcast %182 : vector<1x256xf32> to vector<8x256xf32>
    %184 = arith.mulf %181, %183 : vector<8x256xf32>
    %185 = tpu.concatenate %156, %160, %164, %168, %150, %172, %176, %180, %184 in 0 : vector<8x256xf32>, vector<8x256xf32>, vector<8x256xf32>, vector<8x256xf32>, vector<8x256xf32>, vector<8x256xf32>, vector<8x256xf32>, vector<8x256xf32>, vector<8x256xf32> -> vector<72x256xf32>
    %cst_88 = arith.constant dense<0.000000e+00> : vector<8x256xf32>
    %186 = tpu.matmul %152, %185, %cst_88 {dimension_numbers = #tpu.dot_dimension_numbers<[1], [0], [0], [1], [0, 0, 1, 1], [], []>} : vector<8x72xf32>, vector<72x256xf32>, vector<8x256xf32> -> vector<8x256xf32>
    %187 = vector.extract_strided_slice %151 {offsets = [0, 0], sizes = [8, 1], strides = [1, 1]} : vector<8x3xf32> to vector<8x1xf32>
    %188 = vector.broadcast %187 : vector<8x1xf32> to vector<8x256xf32>
    %189 = arith.addf %186, %188 : vector<8x256xf32>
    %190 = vector.shape_cast %189 : vector<8x256xf32> to vector<1x8x256xf32>
    %cst_89 = arith.constant dense<0.000000e+00> : vector<1xf32>
    %191 = vector.multi_reduction <add>, %190, %cst_89 [1, 2] : vector<1x8x256xf32> to vector<1xf32>
    %192 = vector.shape_cast %191 : vector<1xf32> to vector<1x1x1xf32>
    %193 = vector.extract %192[0, 0, 0] : f32 from vector<1x1x1xf32>
    %194 = vector.broadcast %193 : f32 to vector<1x1xf32>
    %cst_90 = arith.constant 2.048000e+03 : f32
    %195 = vector.broadcast %cst_90 : f32 to vector<1x1xf32>
    %196 = arith.divf %194, %195 : vector<1x1xf32>
    %197 = vector.broadcast %196 : vector<1x1xf32> to vector<8x256xf32>
    %198 = arith.subf %189, %197 : vector<8x256xf32>
    %199 = arith.mulf %198, %198 : vector<8x256xf32>
    %200 = vector.shape_cast %199 : vector<8x256xf32> to vector<1x8x256xf32>
    %cst_91 = arith.constant dense<0.000000e+00> : vector<1xf32>
    %201 = vector.multi_reduction <add>, %200, %cst_91 [1, 2] : vector<1x8x256xf32> to vector<1xf32>
    %202 = vector.shape_cast %201 : vector<1xf32> to vector<1x1x1xf32>
    %203 = vector.extract %202[0, 0, 0] : f32 from vector<1x1x1xf32>
    %204 = vector.broadcast %203 : f32 to vector<1x1xf32>
    %cst_92 = arith.constant 2.048000e+03 : f32
    %205 = vector.broadcast %cst_92 : f32 to vector<1x1xf32>
    %206 = arith.divf %204, %205 : vector<1x1xf32>
    %207 = vector.extract_strided_slice %151 {offsets = [0, 1], sizes = [8, 1], strides = [1, 1]} : vector<8x3xf32> to vector<8x1xf32>
    %cst_93 = arith.constant 9.99999974E-6 : f32
    %208 = vector.broadcast %cst_93 : f32 to vector<1x1xf32>
    %209 = arith.addf %206, %208 : vector<1x1xf32>
    %210 = math.rsqrt %209 : vector<1x1xf32>
    %211 = vector.broadcast %210 : vector<1x1xf32> to vector<8x1xf32>
    %212 = arith.mulf %207, %211 : vector<8x1xf32>
    %213 = vector.extract_strided_slice %151 {offsets = [0, 2], sizes = [8, 1], strides = [1, 1]} : vector<8x3xf32> to vector<8x1xf32>
    %214 = vector.broadcast %196 : vector<1x1xf32> to vector<8x1xf32>
    %215 = arith.mulf %214, %212 : vector<8x1xf32>
    %216 = arith.subf %213, %215 : vector<8x1xf32>
    %217 = vector.broadcast %212 : vector<8x1xf32> to vector<8x256xf32>
    %218 = arith.mulf %189, %217 : vector<8x256xf32>
    %219 = vector.broadcast %216 : vector<8x1xf32> to vector<8x256xf32>
    %220 = arith.addf %218, %219 : vector<8x256xf32>
    %cst_94 = arith.constant 0.000000e+00 : f32
    %221 = vector.broadcast %cst_94 : f32 to vector<8x256xf32>
    %222 = arith.maximumf %220, %221 : vector<8x256xf32>
    %c0_95 = arith.constant 0 : index
    %c0_96 = arith.constant 0 : index
    %223 = vector.load %arg11[%c0_95, %c0_96] : memref<8x3xf32, #tpu.memory_space<vmem>>, vector<8x3xf32>
    %c0_97 = arith.constant 0 : index
    %c0_98 = arith.constant 0 : index
    %224 = vector.load %arg10[%c0_97, %c0_98] : memref<8x72xf32, #tpu.memory_space<vmem>>, vector<8x72xf32>
    %c17_i32_99 = arith.constant 17 : i32
    %225 = tpu.dynamic_rotate %222 by %c17_i32_99 dim 1 : vector<8x256xf32>, i32 -> vector<8x256xf32>
    %c0_100 = arith.constant 0 : index
    %c0_101 = arith.constant 0 : index
    %226 = vector.load %arg3[%c0_100, %c0_101] : memref<9x256xf32, #tpu.memory_space<vmem>>, vector<1x256xf32>
    %227 = vector.broadcast %226 : vector<1x256xf32> to vector<8x256xf32>
    %228 = arith.mulf %225, %227 : vector<8x256xf32>
    %c16_i32_102 = arith.constant 16 : i32
    %229 = tpu.dynamic_rotate %222 by %c16_i32_102 dim 1 : vector<8x256xf32>, i32 -> vector<8x256xf32>
    %c1_103 = arith.constant 1 : index
    %c0_104 = arith.constant 0 : index
    %230 = vector.load %arg3[%c1_103, %c0_104] : memref<9x256xf32, #tpu.memory_space<vmem>>, vector<1x256xf32>
    %231 = vector.broadcast %230 : vector<1x256xf32> to vector<8x256xf32>
    %232 = arith.mulf %229, %231 : vector<8x256xf32>
    %c15_i32_105 = arith.constant 15 : i32
    %233 = tpu.dynamic_rotate %222 by %c15_i32_105 dim 1 : vector<8x256xf32>, i32 -> vector<8x256xf32>
    %c2_106 = arith.constant 2 : index
    %c0_107 = arith.constant 0 : index
    %234 = vector.load %arg3[%c2_106, %c0_107] : memref<9x256xf32, #tpu.memory_space<vmem>>, vector<1x256xf32>
    %235 = vector.broadcast %234 : vector<1x256xf32> to vector<8x256xf32>
    %236 = arith.mulf %233, %235 : vector<8x256xf32>
    %c1_i32_108 = arith.constant 1 : i32
    %237 = tpu.dynamic_rotate %222 by %c1_i32_108 dim 1 : vector<8x256xf32>, i32 -> vector<8x256xf32>
    %c3_109 = arith.constant 3 : index
    %c0_110 = arith.constant 0 : index
    %238 = vector.load %arg3[%c3_109, %c0_110] : memref<9x256xf32, #tpu.memory_space<vmem>>, vector<1x256xf32>
    %239 = vector.broadcast %238 : vector<1x256xf32> to vector<8x256xf32>
    %240 = arith.mulf %237, %239 : vector<8x256xf32>
    %c255_i32_111 = arith.constant 255 : i32
    %241 = tpu.dynamic_rotate %222 by %c255_i32_111 dim 1 : vector<8x256xf32>, i32 -> vector<8x256xf32>
    %c5_112 = arith.constant 5 : index
    %c0_113 = arith.constant 0 : index
    %242 = vector.load %arg3[%c5_112, %c0_113] : memref<9x256xf32, #tpu.memory_space<vmem>>, vector<1x256xf32>
    %243 = vector.broadcast %242 : vector<1x256xf32> to vector<8x256xf32>
    %244 = arith.mulf %241, %243 : vector<8x256xf32>
    %c241_i32_114 = arith.constant 241 : i32
    %245 = tpu.dynamic_rotate %222 by %c241_i32_114 dim 1 : vector<8x256xf32>, i32 -> vector<8x256xf32>
    %c6_115 = arith.constant 6 : index
    %c0_116 = arith.constant 0 : index
    %246 = vector.load %arg3[%c6_115, %c0_116] : memref<9x256xf32, #tpu.memory_space<vmem>>, vector<1x256xf32>
    %247 = vector.broadcast %246 : vector<1x256xf32> to vector<8x256xf32>
    %248 = arith.mulf %245, %247 : vector<8x256xf32>
    %c240_i32_117 = arith.constant 240 : i32
    %249 = tpu.dynamic_rotate %222 by %c240_i32_117 dim 1 : vector<8x256xf32>, i32 -> vector<8x256xf32>
    %c7_118 = arith.constant 7 : index
    %c0_119 = arith.constant 0 : index
    %250 = vector.load %arg3[%c7_118, %c0_119] : memref<9x256xf32, #tpu.memory_space<vmem>>, vector<1x256xf32>
    %251 = vector.broadcast %250 : vector<1x256xf32> to vector<8x256xf32>
    %252 = arith.mulf %249, %251 : vector<8x256xf32>
    %c239_i32_120 = arith.constant 239 : i32
    %253 = tpu.dynamic_rotate %222 by %c239_i32_120 dim 1 : vector<8x256xf32>, i32 -> vector<8x256xf32>
    %c8_121 = arith.constant 8 : index
    %c0_122 = arith.constant 0 : index
    %254 = vector.load %arg3[%c8_121, %c0_122] : memref<9x256xf32, #tpu.memory_space<vmem>>, vector<1x256xf32>
    %255 = vector.broadcast %254 : vector<1x256xf32> to vector<8x256xf32>
    %256 = arith.mulf %253, %255 : vector<8x256xf32>
    %257 = tpu.concatenate %228, %232, %236, %240, %222, %244, %248, %252, %256 in 0 : vector<8x256xf32>, vector<8x256xf32>, vector<8x256xf32>, vector<8x256xf32>, vector<8x256xf32>, vector<8x256xf32>, vector<8x256xf32>, vector<8x256xf32>, vector<8x256xf32> -> vector<72x256xf32>
    %cst_123 = arith.constant dense<0.000000e+00> : vector<8x256xf32>
    %258 = tpu.matmul %224, %257, %cst_123 {dimension_numbers = #tpu.dot_dimension_numbers<[1], [0], [0], [1], [0, 0, 1, 1], [], []>} : vector<8x72xf32>, vector<72x256xf32>, vector<8x256xf32> -> vector<8x256xf32>
    %259 = vector.extract_strided_slice %223 {offsets = [0, 0], sizes = [8, 1], strides = [1, 1]} : vector<8x3xf32> to vector<8x1xf32>
    %260 = vector.broadcast %259 : vector<8x1xf32> to vector<8x256xf32>
    %261 = arith.addf %258, %260 : vector<8x256xf32>
    %262 = vector.shape_cast %261 : vector<8x256xf32> to vector<1x8x256xf32>
    %cst_124 = arith.constant dense<0.000000e+00> : vector<1xf32>
    %263 = vector.multi_reduction <add>, %262, %cst_124 [1, 2] : vector<1x8x256xf32> to vector<1xf32>
    %264 = vector.shape_cast %263 : vector<1xf32> to vector<1x1x1xf32>
    %265 = vector.extract %264[0, 0, 0] : f32 from vector<1x1x1xf32>
    %266 = vector.broadcast %265 : f32 to vector<1x1xf32>
    %cst_125 = arith.constant 2.048000e+03 : f32
    %267 = vector.broadcast %cst_125 : f32 to vector<1x1xf32>
    %268 = arith.divf %266, %267 : vector<1x1xf32>
    %269 = vector.broadcast %268 : vector<1x1xf32> to vector<8x256xf32>
    %270 = arith.subf %261, %269 : vector<8x256xf32>
    %271 = arith.mulf %270, %270 : vector<8x256xf32>
    %272 = vector.shape_cast %271 : vector<8x256xf32> to vector<1x8x256xf32>
    %cst_126 = arith.constant dense<0.000000e+00> : vector<1xf32>
    %273 = vector.multi_reduction <add>, %272, %cst_126 [1, 2] : vector<1x8x256xf32> to vector<1xf32>
    %274 = vector.shape_cast %273 : vector<1xf32> to vector<1x1x1xf32>
    %275 = vector.extract %274[0, 0, 0] : f32 from vector<1x1x1xf32>
    %276 = vector.broadcast %275 : f32 to vector<1x1xf32>
    %cst_127 = arith.constant 2.048000e+03 : f32
    %277 = vector.broadcast %cst_127 : f32 to vector<1x1xf32>
    %278 = arith.divf %276, %277 : vector<1x1xf32>
    %279 = vector.extract_strided_slice %223 {offsets = [0, 1], sizes = [8, 1], strides = [1, 1]} : vector<8x3xf32> to vector<8x1xf32>
    %cst_128 = arith.constant 9.99999974E-6 : f32
    %280 = vector.broadcast %cst_128 : f32 to vector<1x1xf32>
    %281 = arith.addf %278, %280 : vector<1x1xf32>
    %282 = math.rsqrt %281 : vector<1x1xf32>
    %283 = vector.broadcast %282 : vector<1x1xf32> to vector<8x1xf32>
    %284 = arith.mulf %279, %283 : vector<8x1xf32>
    %285 = vector.extract_strided_slice %223 {offsets = [0, 2], sizes = [8, 1], strides = [1, 1]} : vector<8x3xf32> to vector<8x1xf32>
    %286 = vector.broadcast %268 : vector<1x1xf32> to vector<8x1xf32>
    %287 = arith.mulf %286, %284 : vector<8x1xf32>
    %288 = arith.subf %285, %287 : vector<8x1xf32>
    %289 = vector.broadcast %284 : vector<8x1xf32> to vector<8x256xf32>
    %290 = arith.mulf %261, %289 : vector<8x256xf32>
    %291 = vector.broadcast %288 : vector<8x1xf32> to vector<8x256xf32>
    %292 = arith.addf %290, %291 : vector<8x256xf32>
    %cst_129 = arith.constant 0.000000e+00 : f32
    %293 = vector.broadcast %cst_129 : f32 to vector<8x256xf32>
    %294 = arith.maximumf %292, %293 : vector<8x256xf32>
    %c0_130 = arith.constant 0 : index
    %c0_131 = arith.constant 0 : index
    %295 = vector.load %arg12[%c0_130, %c0_131] : memref<4x72xf32, #tpu.memory_space<vmem>>, vector<4x72xf32>
    %c17_i32_132 = arith.constant 17 : i32
    %296 = tpu.dynamic_rotate %294 by %c17_i32_132 dim 1 : vector<8x256xf32>, i32 -> vector<8x256xf32>
    %c0_133 = arith.constant 0 : index
    %c0_134 = arith.constant 0 : index
    %297 = vector.load %arg3[%c0_133, %c0_134] : memref<9x256xf32, #tpu.memory_space<vmem>>, vector<1x256xf32>
    %298 = vector.broadcast %297 : vector<1x256xf32> to vector<8x256xf32>
    %299 = arith.mulf %296, %298 : vector<8x256xf32>
    %c16_i32_135 = arith.constant 16 : i32
    %300 = tpu.dynamic_rotate %294 by %c16_i32_135 dim 1 : vector<8x256xf32>, i32 -> vector<8x256xf32>
    %c1_136 = arith.constant 1 : index
    %c0_137 = arith.constant 0 : index
    %301 = vector.load %arg3[%c1_136, %c0_137] : memref<9x256xf32, #tpu.memory_space<vmem>>, vector<1x256xf32>
    %302 = vector.broadcast %301 : vector<1x256xf32> to vector<8x256xf32>
    %303 = arith.mulf %300, %302 : vector<8x256xf32>
    %c15_i32_138 = arith.constant 15 : i32
    %304 = tpu.dynamic_rotate %294 by %c15_i32_138 dim 1 : vector<8x256xf32>, i32 -> vector<8x256xf32>
    %c2_139 = arith.constant 2 : index
    %c0_140 = arith.constant 0 : index
    %305 = vector.load %arg3[%c2_139, %c0_140] : memref<9x256xf32, #tpu.memory_space<vmem>>, vector<1x256xf32>
    %306 = vector.broadcast %305 : vector<1x256xf32> to vector<8x256xf32>
    %307 = arith.mulf %304, %306 : vector<8x256xf32>
    %c1_i32_141 = arith.constant 1 : i32
    %308 = tpu.dynamic_rotate %294 by %c1_i32_141 dim 1 : vector<8x256xf32>, i32 -> vector<8x256xf32>
    %c3_142 = arith.constant 3 : index
    %c0_143 = arith.constant 0 : index
    %309 = vector.load %arg3[%c3_142, %c0_143] : memref<9x256xf32, #tpu.memory_space<vmem>>, vector<1x256xf32>
    %310 = vector.broadcast %309 : vector<1x256xf32> to vector<8x256xf32>
    %311 = arith.mulf %308, %310 : vector<8x256xf32>
    %c255_i32_144 = arith.constant 255 : i32
    %312 = tpu.dynamic_rotate %294 by %c255_i32_144 dim 1 : vector<8x256xf32>, i32 -> vector<8x256xf32>
    %c5_145 = arith.constant 5 : index
    %c0_146 = arith.constant 0 : index
    %313 = vector.load %arg3[%c5_145, %c0_146] : memref<9x256xf32, #tpu.memory_space<vmem>>, vector<1x256xf32>
    %314 = vector.broadcast %313 : vector<1x256xf32> to vector<8x256xf32>
    %315 = arith.mulf %312, %314 : vector<8x256xf32>
    %c241_i32_147 = arith.constant 241 : i32
    %316 = tpu.dynamic_rotate %294 by %c241_i32_147 dim 1 : vector<8x256xf32>, i32 -> vector<8x256xf32>
    %c6_148 = arith.constant 6 : index
    %c0_149 = arith.constant 0 : index
    %317 = vector.load %arg3[%c6_148, %c0_149] : memref<9x256xf32, #tpu.memory_space<vmem>>, vector<1x256xf32>
    %318 = vector.broadcast %317 : vector<1x256xf32> to vector<8x256xf32>
    %319 = arith.mulf %316, %318 : vector<8x256xf32>
    %c240_i32_150 = arith.constant 240 : i32
    %320 = tpu.dynamic_rotate %294 by %c240_i32_150 dim 1 : vector<8x256xf32>, i32 -> vector<8x256xf32>
    %c7_151 = arith.constant 7 : index
    %c0_152 = arith.constant 0 : index
    %321 = vector.load %arg3[%c7_151, %c0_152] : memref<9x256xf32, #tpu.memory_space<vmem>>, vector<1x256xf32>
    %322 = vector.broadcast %321 : vector<1x256xf32> to vector<8x256xf32>
    %323 = arith.mulf %320, %322 : vector<8x256xf32>
    %c239_i32_153 = arith.constant 239 : i32
    %324 = tpu.dynamic_rotate %294 by %c239_i32_153 dim 1 : vector<8x256xf32>, i32 -> vector<8x256xf32>
    %c8_154 = arith.constant 8 : index
    %c0_155 = arith.constant 0 : index
    %325 = vector.load %arg3[%c8_154, %c0_155] : memref<9x256xf32, #tpu.memory_space<vmem>>, vector<1x256xf32>
    %326 = vector.broadcast %325 : vector<1x256xf32> to vector<8x256xf32>
    %327 = arith.mulf %324, %326 : vector<8x256xf32>
    %328 = tpu.concatenate %299, %303, %307, %311, %294, %315, %319, %323, %327 in 0 : vector<8x256xf32>, vector<8x256xf32>, vector<8x256xf32>, vector<8x256xf32>, vector<8x256xf32>, vector<8x256xf32>, vector<8x256xf32>, vector<8x256xf32>, vector<8x256xf32> -> vector<72x256xf32>
    %cst_156 = arith.constant dense<0.000000e+00> : vector<4x256xf32>
    %329 = tpu.matmul %295, %328, %cst_156 {dimension_numbers = #tpu.dot_dimension_numbers<[1], [0], [0], [1], [0, 0, 1, 1], [], []>} : vector<4x72xf32>, vector<72x256xf32>, vector<4x256xf32> -> vector<4x256xf32>
    %c0_157 = arith.constant 0 : index
    %c0_158 = arith.constant 0 : index
    %330 = vector.load %arg13[%c0_157, %c0_158] : memref<4x1xf32, #tpu.memory_space<vmem>>, vector<4x1xf32>
    %331 = vector.broadcast %330 : vector<4x1xf32> to vector<4x256xf32>
    %332 = arith.addf %329, %331 : vector<4x256xf32>
    %333 = math.exp %332 : vector<4x256xf32>
    %c0_159 = arith.constant 0 : index
    %c0_160 = arith.constant 0 : index
    %c0_161 = arith.constant 0 : index
    %334 = vector.load %arg14[%c0_159, %c0_160, %c0_161] : memref<1x4x256xf32, #tpu.memory_space<vmem>>, vector<1x4x256xf32>
    %335 = vector.shape_cast %334 : vector<1x4x256xf32> to vector<4x256xf32>
    %336 = vector.shape_cast %333 : vector<4x256xf32> to vector<1x4x256xf32>
    tpu.vector_store %arg14[%c0_159, %c0_160, %c0_161], %336 {strides = array<i32>} : memref<1x4x256xf32, #tpu.memory_space<vmem>>, vector<1x4x256xf32>,
    return
  }
  func.func @transform_0(%arg0: i32) -> (i32, i32, i32) {
    %c0_i32 = arith.constant 0 : i32
    %c0_i32_0 = arith.constant 0 : i32
    %c0_i32_1 = arith.constant 0 : i32
    return %arg0, %c0_i32, %c0_i32_0 : i32, i32, i32
  }
  func.func @transform_1(%arg0: i32) -> (i32, i32, i32) {
    %c2_i32 = arith.constant 2 : i32
    %c0_i32 = arith.constant 0 : i32
    %0 = arith.cmpi eq, %c2_i32, %c0_i32 : i32
    %c1_i32 = arith.constant 1 : i32
    %1 = arith.select %0, %c1_i32, %c2_i32 : i32
    %2 = arith.remsi %arg0, %1 : i32
    %c0_i32_0 = arith.constant 0 : i32
    %3 = arith.cmpi ne, %2, %c0_i32_0 : i32
    %c0_i32_1 = arith.constant 0 : i32
    %4 = arith.cmpi slt, %2, %c0_i32_1 : i32
    %c0_i32_2 = arith.constant 0 : i32
    %5 = arith.cmpi slt, %1, %c0_i32_2 : i32
    %6 = arith.xori %4, %5 : i1
    %7 = arith.andi %6, %3 : i1
    %8 = arith.addi %2, %1 : i32
    %9 = arith.select %7, %8, %2 : i32
    %c0_i32_3 = arith.constant 0 : i32
    %c0_i32_4 = arith.constant 0 : i32
    %c0_i32_5 = arith.constant 0 : i32
    return %9, %c0_i32_3, %c0_i32_4 : i32, i32, i32
  }
  func.func @transform_2(%arg0: i32) -> (i32, i32) {
    %c0_i32 = arith.constant 0 : i32
    %c0_i32_0 = arith.constant 0 : i32
    %c0_i32_1 = arith.constant 0 : i32
    return %c0_i32, %c0_i32_0 : i32, i32
  }
  func.func @transform_3(%arg0: i32) -> (i32, i32) {
    %c0_i32 = arith.constant 0 : i32
    %c0_i32_0 = arith.constant 0 : i32
    %c0_i32_1 = arith.constant 0 : i32
    return %c0_i32, %c0_i32_0 : i32, i32
  }
  func.func @transform_4(%arg0: i32) -> (i32, i32) {
    %c0_i32 = arith.constant 0 : i32
    %c0_i32_0 = arith.constant 0 : i32
    %c0_i32_1 = arith.constant 0 : i32
    return %c0_i32, %c0_i32_0 : i32, i32
  }
  func.func @transform_5(%arg0: i32) -> (i32, i32) {
    %c0_i32 = arith.constant 0 : i32
    %c0_i32_0 = arith.constant 0 : i32
    %c0_i32_1 = arith.constant 0 : i32
    return %c0_i32, %c0_i32_0 : i32, i32
  }
  func.func @transform_6(%arg0: i32) -> (i32, i32) {
    %c0_i32 = arith.constant 0 : i32
    %c0_i32_0 = arith.constant 0 : i32
    %c0_i32_1 = arith.constant 0 : i32
    return %c0_i32, %c0_i32_0 : i32, i32
  }
  func.func @transform_7(%arg0: i32) -> (i32, i32) {
    %c0_i32 = arith.constant 0 : i32
    %c0_i32_0 = arith.constant 0 : i32
    %c0_i32_1 = arith.constant 0 : i32
    return %c0_i32, %c0_i32_0 : i32, i32
  }
  func.func @transform_8(%arg0: i32) -> (i32, i32) {
    %c0_i32 = arith.constant 0 : i32
    %c0_i32_0 = arith.constant 0 : i32
    %c0_i32_1 = arith.constant 0 : i32
    return %c0_i32, %c0_i32_0 : i32, i32
  }
  func.func @transform_9(%arg0: i32) -> (i32, i32) {
    %c0_i32 = arith.constant 0 : i32
    %c0_i32_0 = arith.constant 0 : i32
    %c0_i32_1 = arith.constant 0 : i32
    return %c0_i32, %c0_i32_0 : i32, i32
  }
  func.func @transform_10(%arg0: i32) -> (i32, i32) {
    %c0_i32 = arith.constant 0 : i32
    %c0_i32_0 = arith.constant 0 : i32
    %c0_i32_1 = arith.constant 0 : i32
    return %c0_i32, %c0_i32_0 : i32, i32
  }
  func.func @transform_11(%arg0: i32) -> (i32, i32) {
    %c0_i32 = arith.constant 0 : i32
    %c0_i32_0 = arith.constant 0 : i32
    %c0_i32_1 = arith.constant 0 : i32
    return %c0_i32, %c0_i32_0 : i32, i32
  }
  func.func @transform_12(%arg0: i32) -> (i32, i32) {
    %c0_i32 = arith.constant 0 : i32
    %c0_i32_0 = arith.constant 0 : i32
    %c0_i32_1 = arith.constant 0 : i32
    return %c0_i32, %c0_i32_0 : i32, i32
  }
  func.func @transform_13(%arg0: i32) -> (i32, i32, i32) {
    %c0_i32 = arith.constant 0 : i32
    %c0_i32_0 = arith.constant 0 : i32
    %c0_i32_1 = arith.constant 0 : i32
    return %arg0, %c0_i32, %c0_i32_0 : i32, i32, i32
  }
}

</mosaic_0001>

<bundles_post_ra>
// kernel: dense_box_regressor_forward.1
= control target key start
LH: loop header
LB: loop body
LE: loop exit
PB: predicated region body
PF: predicated region fallthrough
CT: control target
= control target key end

     0   :  { %s2363_s25 = smov 0   ;;  %s3349_s0 = inlined_call_operand.vmem [shape: f32[4,32,256], index: 0, kind: input, shape index: {}]   ;;  %s3350_s1 = inlined_call_operand.vmem [shape: f32[2,1,32], index: 1, kind: input, shape index: {}]   ;;  %s3351_s2 = inlined_call_operand.vmem [shape: f32[9,256], index: 2, kind: input, shape index: {}]   ;;  %s3352_s3 = inlined_call_operand.vmem [shape: f32[8,288], index: 3, kind: input, shape index: {}]   ;;  %s3353_s4 = inlined_call_operand.vmem [shape: f32[8,3], index: 4, kind: input, shape index: {}]   ;;  %s3354_s5 = inlined_call_operand.vmem [shape: f32[8,72], index: 5, kind: input, shape index: {}]   ;;  %s3355_s6 = inlined_call_operand.vmem [shape: f32[8,3], index: 6, kind: input, shape index: {}]   ;;  %s3356_s7 = inlined_call_operand.vmem [shape: f32[8,72], index: 7, kind: input, shape index: {}]   ;;  %s3357_s8 = inlined_call_operand.vmem [shape: f32[8,3], index: 8, kind: input, shape index: {}]   ;;  %s3358_s9 = inlined_call_operand.vmem [shape: f32[8,72], index: 9, kind: input, shape index: {}]   ;;  %s3359_s10 = inlined_call_operand.vmem [shape: f32[8,3], index: 10, kind: input, shape index: {}]   ;;  %s3360_s11 = inlined_call_operand.vmem [shape: f32[4,72], index: 11, kind: input, shape index: {}]   ;;  %s3361_s12 = inlined_call_operand.vmem [shape: f32[4,1], index: 12, kind: input, shape index: {}]   ;;  %s3362_s13 = inlined_call_operand.vmem [shape: f32[4,4,256], index: 13, kind: output, shape index: {}]  }
   0x1 LB: > { %s2029_s26 = sadd.s32 4294967295, %s2279_s25   ;;  %p2039_p0 = scmp.ge.s32.totalorder %s2279_s25, 1  ;;  %s2279_s25 = sphi %s2363_s25, %s23_s25  }
   0x2   : > { %p443_p1 = scmp.lt.s32.totalorder %s2279_s25, 5 }
   0x4   : > { %p444_p2 = pnand %p2039_p0, %p443_p1 }
   0x5   : > { %p502_p3 = scmp.lt.s32.totalorder (!%p444_p2), %s2029_s26, 3  ;;  %v2281_v0 = vmov (!%p444_p2), 0.0   ;;  %p507_p4 = scmp.lt.s32.totalorder (!%p444_p2), %s2029_s26, 0  ;;  %vm548_vm0 = vcmask (!%p444_p2), 261120   ;;  %v623_v14 = vlaneseq (!%p444_p2)  ;;  %v641_v29 = vld [vmem:[%s3352_s3 + $0x8] sm:$0xff] (!%p444_p2)  ;;  %v2290_v36 = vmov (!%p444_p2), 0  }
   0x6   : > { %447 = sbr.rel (%p444_p2) target bundleno = 4976 (0x1370), region = 72  ;;  %616 = vmatprep.mubr.f32.mxu0 (!%p444_p2), %v2281_v0  ;;  %s508_s27 = ssub.s32 (!%p444_p2), 0, %s2029_s26  ;;  %1084 = vmatprep.mubr.f32.mxu1 (!%p444_p2), %v641_v29  ;;  %v2564_v37 = vld [vmem:[%s3353_s4] sm:$0xff] (!%p444_p2)  ;;  %vm1287_vm9 = vcmask (!%p444_p2), 588800  }
   0x7   : > { %s2042_s29 = smin.u32 (!%p444_p2), %s2029_s26, %s508_s27  ;;  %v2396_v15 = vshrl.u32 (!%p444_p2), %v623_v14, 7  ;;  %s2282_s23 = smov (!%p444_p2), 17   ;;  %2248 = vset.pattern.permute.xlu0 (!%p444_p2), %v2290_v36  ;;  %v2602_v56 = vand.u32 (!%p444_p2), 127, %v623_v14  ;;  %v670_v60 = vld [vmem:[%s3351_s2] ss:$8 sm:$0x3] (!%p444_p2) }
   0x8   : > { %s510_s14 = sand.u32 (!%p444_p2), 1, %s2042_s29   ;;  %s2283_s24 = smov (!%p444_p2), 16  }
   0x9   : > { %s511_s18 = ssub.s32 (!%p444_p2), 0, %s510_s14  ;;  %v2399_v16 = vsub.s32 (!%p444_p2), 0, %v2396_v15  ;;  %s2285_s27 = smov (!%p444_p2), 1   ;;  %v2609_v59 = vsub.s32 (!%p444_p2), 1, %v2396_v15  ;;  %vm661_vm1 = vcmp.lt.s32.totalorder (!%p444_p2), %v2602_v56, 17  ;;  %vm706_vm2 = vcmp.lt.s32.totalorder (!%p444_p2), %v2602_v56, 16 }
   0xa   : > { %s2286_s29 = smov (!%p444_p2), 127   ;;  %s2289_s15 = smov (!%p444_p2), 111   ;;  %vm752_vm3 = vcmp.lt.s32.totalorder (!%p444_p2), %v2602_v56, 15  ;;  %vm798_vm4 = vcmp.lt.s32.totalorder (!%p444_p2), %v2602_v56, 1  ;;  %vm844_vm5 = vcmp.lt.s32.totalorder (!%p444_p2), %v2602_v56, 127  ;;  %vm890_vm6 = vcmp.lt.s32.totalorder (!%p444_p2), %v2602_v56, 113 }
   0xb   : > { %v2618_v63 = vrot.slane (!%p444_p2), %v670_v60, %v2399_v16  ;;  %vm936_vm7 = vcmp.lt.s32.totalorder (!%p444_p2), %v2602_v56, 112  ;;  %vm982_vm8 = vcmp.lt.s32.totalorder (!%p444_p2), %v2602_v56, 111 }
   0xd   : > { %s2372_s28 = scalar_select %p502_p3, %s2029_s26, 3 }
   0xe   : > { %s3364_s18 = smov (!%p507_p4, %s511_s18), %s510_s14  ;;  %s2284_s26 = smov 15  }
   0xf   : > { %s2062_s30 = sshll.u32 %s2372_s28, 6  ;;  %p2044_p5 = scmp.lt.s32.totalorder %s3364_s18, 0 }
  0x10   : > { %s506_s17 = scalar_lea.vmem %s3349_s0, %s2062_s30  ;;  %s517_s19 = sadd.s32 2, %s3364_s18 }
  0x11   : > { %v2378_v1 = vld [vmem:[%s506_s17 + $0x8] sm:$0xff]  ;;  %v2380_v2 = vld [vmem:[%s506_s17 + $0x18] sm:$0xff]  ;;  %v539_v3 = vld [vmem:[%s506_s17] sm:$0xff]  ;;  %s3366_s19 = smov (!%p2044_p5, %s517_s19), %s3364_s18  ;;  %s2287_s30 = smov 113  }
  0x12   : > { %v2064_v4 = vpack.c.bf16 %v2380_v2, %v2378_v1  ;;  %v541_v5 = vld [vmem:[%s506_s17 + $0x10] sm:$0xff]  ;;  %v2384_v6 = vld [vmem:[%s506_s17 + $0x28] sm:$0xff]  ;;  %v2386_v7 = vld [vmem:[%s506_s17 + $0x38] sm:$0xff]  ;;  %p519_p6 = scmp.lt.s32.totalorder %s3366_s19, 1  ;;  %s2288_s14 = smov 112  }
  0x13   : > { %v2066_v8 = vpack.c.bf16 %v541_v5, %v539_v3  ;;  %v2068_v9 = vpack.c.bf16 %v2386_v7, %v2384_v6  ;;  %v543_v10 = vld [vmem:[%s506_s17 + $0x20] sm:$0xff]  ;;  %v545_v11 = vld [vmem:[%s506_s17 + $0x30] sm:$0xff] }
  0x14   : > { %2065 = vmatprep.subr.bf16.mxu0 %v2064_v4  ;;  %v2070_v12 = vpack.c.bf16 %v545_v11, %v543_v10  ;;  %s3368_s19 = smov (!%p519_p6, %s3366_s19), 1 }
  0x15   : > { %2067 = vmatpush1.bf16.msra.mxu0 %v2066_v8  ;;  %s521_s22 = scalar_lea.vmem %s3350_s1, %s3368_s19  ;;  %v2048_v8 = vld [vmem:[%s3351_s2 + $0x1] ss:$8 sm:$0x3] }
  0x16   : > { %2069 = vmatprep.subr.bf16.mxu0 %v2068_v9  ;;  %v547_v13 = vld [vmem:[%s521_s22] sm:$0x1] }
  0x19   : > { %2071 = vmatpush1.bf16.msra.mxu0 %v2070_v12 }
  0x1c   : > { %2047 = vmatmul.mubr.msk.f32.vlgmr.msra.gmra.mrb[0].mxu0 %vm548_vm0, %v547_v13 }
  0x1d   : > { %1355 = vmatprep.mubr.f32.mxu0 %v2281_v0 }
  0xef   : > { %v618_v17 = vpop.f32.mrb[0].mxu0 }
  0xf0   : > { %v626_v18 = vrot.slane %v618_v17, %v2399_v16  ;;  %v620_v19 = vpop.f32.mrb[1].mxu0 }
  0xf1   : > { %v630_v24 = vrot.slane %v620_v19, %v2399_v16  ;;  %v2645_v19 = vrot.slane %v2048_v8, %v2609_v59 }
  0xf2   : > { %v2402_v20 = vmul.f32 %v626_v18, %v539_v3  ;;  %v2404_v21 = vmul.f32 %v626_v18, %v545_v11  ;;  %v2410_v22 = vmul.f32 %v626_v18, %v541_v5  ;;  %v2416_v23 = vmul.f32 %v626_v18, %v543_v10 }
  0xf3   : > { %v2464_v25 = vmul.f32 %v630_v24, %v2378_v1  ;;  %v2471_v26 = vmul.f32 %v630_v24, %v2380_v2  ;;  %v2478_v27 = vmul.f32 %v630_v24, %v2384_v6  ;;  %v2481_v28 = vmul.f32 %v630_v24, %v2386_v7 }
  0xf4   : > { %649 = vrot.lane.b32.xlu1 %v2404_v21, %s2282_s23  ;;  %643 = vrot.lane.b32.xlu0 %v2402_v20, %s2282_s23  ;;  %v2621_v1 = vrot.slane %v670_v60, %v2609_v59  ;;  %v2642_v18 = vrot.slane %v2048_v8, %v2399_v16 }
  0xf8   : > { %692 = vrot.lane.b32.xlu1 %v2410_v22, %s2283_s24  ;;  %645 = vrot.lane.b32.xlu0 %v2410_v22, %s2282_s23 }
  0xfc   : > { %696 = vrot.lane.b32.xlu1 %v2404_v21, %s2283_s24  ;;  %647 = vrot.lane.b32.xlu0 %v2416_v23, %s2282_s23 }
 0x100   : > { %738 = vrot.lane.b32.xlu1 %v2410_v22, %s2284_s26  ;;  %690 = vrot.lane.b32.xlu0 %v2402_v20, %s2283_s24 }
 0x104   : > { %742 = vrot.lane.b32.xlu1 %v2404_v21, %s2284_s26  ;;  %694 = vrot.lane.b32.xlu0 %v2416_v23, %s2283_s24 }
 0x108   : > { %784 = vrot.lane.b32.xlu1 %v2410_v22, %s2285_s27  ;;  %736 = vrot.lane.b32.xlu0 %v2402_v20, %s2284_s26 }
 0x10c   : > { %788 = vrot.lane.b32.xlu1 %v2404_v21, %s2285_s27  ;;  %740 = vrot.lane.b32.xlu0 %v2416_v23, %s2284_s26 }
 0x110   : > { %830 = vrot.lane.b32.xlu1 %v2410_v22, %s2286_s29  ;;  %782 = vrot.lane.b32.xlu0 %v2402_v20, %s2285_s27 }
 0x114   : > { %834 = vrot.lane.b32.xlu1 %v2404_v21, %s2286_s29  ;;  %786 = vrot.lane.b32.xlu0 %v2416_v23, %s2285_s27 }
 0x118   : > { %876 = vrot.lane.b32.xlu1 %v2410_v22, %s2287_s30  ;;  %828 = vrot.lane.b32.xlu0 %v2402_v20, %s2286_s29 }
 0x11c   : > { %880 = vrot.lane.b32.xlu1 %v2404_v21, %s2287_s30  ;;  %832 = vrot.lane.b32.xlu0 %v2416_v23, %s2286_s29 }
 0x120   : > { %922 = vrot.lane.b32.xlu1 %v2410_v22, %s2288_s14  ;;  %874 = vrot.lane.b32.xlu0 %v2402_v20, %s2287_s30 }
 0x124   : > { %926 = vrot.lane.b32.xlu1 %v2404_v21, %s2288_s14  ;;  %878 = vrot.lane.b32.xlu0 %v2416_v23, %s2287_s30 }
 0x128   : > { %920 = vrot.lane.b32.xlu0 %v2402_v20, %s2288_s14  ;;  %651 = vrot.lane.b32.xlu1 %v2464_v25, %s2282_s23 }
 0x12c   : > { %924 = vrot.lane.b32.xlu0 %v2416_v23, %s2288_s14  ;;  %653 = vrot.lane.b32.xlu1 %v2471_v26, %s2282_s23 }
 0x130   : > { %655 = vrot.lane.b32.xlu0 %v2478_v27, %s2282_s23  ;;  %657 = vrot.lane.b32.xlu1 %v2481_v28, %s2282_s23 }
 0x134   : > { %698 = vrot.lane.b32.xlu0 %v2464_v25, %s2283_s24  ;;  %700 = vrot.lane.b32.xlu1 %v2471_v26, %s2283_s24 }
 0x138   : > { %702 = vrot.lane.b32.xlu0 %v2478_v27, %s2283_s24  ;;  %704 = vrot.lane.b32.xlu1 %v2481_v28, %s2283_s24 }
 0x13c   : > { %744 = vrot.lane.b32.xlu0 %v2464_v25, %s2284_s26  ;;  %746 = vrot.lane.b32.xlu1 %v2471_v26, %s2284_s26 }
 0x140   : > { %748 = vrot.lane.b32.xlu0 %v2478_v27, %s2284_s26  ;;  %750 = vrot.lane.b32.xlu1 %v2481_v28, %s2284_s26 }
 0x144   : > { %790 = vrot.lane.b32.xlu0 %v2464_v25, %s2285_s27  ;;  %792 = vrot.lane.b32.xlu1 %v2471_v26, %s2285_s27 }
 0x148   : > { %794 = vrot.lane.b32.xlu0 %v2478_v27, %s2285_s27  ;;  %796 = vrot.lane.b32.xlu1 %v2481_v28, %s2285_s27 }
 0x14c   : > { %966 = vrot.lane.b32.xlu0 %v2402_v20, %s2289_s15  ;;  %968 = vrot.lane.b32.xlu1 %v2410_v22, %s2289_s15 }
 0x150   : > { %970 = vrot.lane.b32.xlu0 %v2416_v23, %s2289_s15  ;;  %972 = vrot.lane.b32.xlu1 %v2404_v21, %s2289_s15 }
 0x154   : > { %836 = vrot.lane.b32.xlu0 %v2464_v25, %s2286_s29  ;;  %838 = vrot.lane.b32.xlu1 %v2471_v26, %s2286_s29 }
 0x158   : > { %840 = vrot.lane.b32.xlu0 %v2478_v27, %s2286_s29  ;;  %842 = vrot.lane.b32.xlu1 %v2481_v28, %s2286_s29 }
 0x15c   : > { %882 = vrot.lane.b32.xlu0 %v2464_v25, %s2287_s30  ;;  %884 = vrot.lane.b32.xlu1 %v2471_v26, %s2287_s30 }
 0x160   : > { %886 = vrot.lane.b32.xlu0 %v2478_v27, %s2287_s30  ;;  %888 = vrot.lane.b32.xlu1 %v2481_v28, %s2287_s30 }
 0x164   : > { %928 = vrot.lane.b32.xlu0 %v2464_v25, %s2288_s14  ;;  %930 = vrot.lane.b32.xlu1 %v2471_v26, %s2288_s14 }
 0x166   : > { %v2542_v30 = vpop.permute.xlu1 %649  ;;  %v644_v31 = vpop.permute.xlu0 %643 }
 0x168   : > { %932 = vrot.lane.b32.xlu0 %v2478_v27, %s2288_s14  ;;  %934 = vrot.lane.b32.xlu1 %v2481_v28, %s2288_s14 }
 0x16a   : > { %v2548_v32 = vpop.permute.xlu1 %692  ;;  %v646_v33 = vpop.permute.xlu0 %645 }
 0x16c   : > { %974 = vrot.lane.b32.xlu0 %v2464_v25, %s2289_s15  ;;  %976 = vrot.lane.b32.xlu1 %v2471_v26, %s2289_s15 }
 0x16e   : > { %v2554_v34 = vpop.permute.xlu1 %696  ;;  %v648_v35 = vpop.permute.xlu0 %647 }
 0x170   : > { %978 = vrot.lane.b32.xlu0 %v2478_v27, %s2289_s15  ;;  %980 = vrot.lane.b32.xlu1 %v2481_v28, %s2289_s15 }
 0x172   : > { %v2566_v38 = vpop.permute.xlu1 %738  ;;  %v691_v39 = vpop.permute.xlu0 %690 }
 0x174   : > { %1014 = vperm.xlu0 %2248, %v2564_v37  }
 0x176   : > { %v2569_v40 = vpop.permute.xlu1 %742  ;;  %v2571_v41 = vpop.permute.xlu0 %694 }
 0x17a   : > { %v2573_v42 = vpop.permute.xlu1 %784  ;;  %v2575_v43 = vpop.permute.xlu0 %736 }
 0x17e   : > { %v2577_v44 = vpop.permute.xlu1 %788  ;;  %v2579_v45 = vpop.permute.xlu0 %740 }
 0x182   : > { %v2581_v46 = vpop.permute.xlu1 %830  ;;  %v2583_v47 = vpop.permute.xlu0 %782 }
 0x186   : > { %v2585_v48 = vpop.permute.xlu1 %834  ;;  %v2587_v49 = vpop.permute.xlu0 %786 }
 0x18a   : > { %v2589_v50 = vpop.permute.xlu1 %876  ;;  %v2591_v51 = vpop.permute.xlu0 %828 }
 0x18e   : > { %v2593_v52 = vpop.permute.xlu1 %880  ;;  %v2595_v53 = vpop.permute.xlu0 %832 }
 0x192   : > { %v2597_v54 = vpop.permute.xlu1 %922  ;;  %v2599_v55 = vpop.permute.xlu0 %874 }
 0x196   : > { %v2604_v57 = vpop.permute.xlu1 %926  ;;  %v2606_v58 = vpop.permute.xlu0 %878 }
 0x19a   : > { %v2614_v61 = vpop.permute.xlu0 %920  ;;  %v652_v62 = vpop.permute.xlu1 %651 }
 0x19b   : > { %v666_v2 = vsel %vm661_vm1, %v652_v62, %v644_v31  ;;  %v662_v3 = vsel %vm661_vm1, %v644_v31, %v652_v62 }
 0x19c   : > { %v683_v9 = vmul.f32 %v2621_v1, %v662_v3  ;;  %v682_v11 = vmul.f32 %v2618_v63, %v666_v2 }
 0x19e   : > { %v2627_v4 = vpop.permute.xlu0 %924  ;;  %v654_v5 = vpop.permute.xlu1 %653 }
 0x19f   : > { %v667_v6 = vsel %vm661_vm1, %v654_v5, %v646_v33  ;;  %v663_v7 = vsel %vm661_vm1, %v646_v33, %v654_v5 }
 0x1a0   : > { %v685_v10 = vmul.f32 %v2621_v1, %v663_v7  ;;  %v684_v12 = vmul.f32 %v2618_v63, %v667_v6 }
 0x1a2   : > { %v656_v13 = vpop.permute.xlu0 %655  ;;  %v658_v14 = vpop.permute.xlu1 %657  ;;  %v2072_v15 = vpack.c.bf16 %v685_v10, %v683_v9  ;;  %v2074_v17 = vpack.c.bf16 %v684_v12, %v682_v11  ;;  %v2049_v11 = vld [vmem:[%s3351_s2 + $0x2] ss:$8 sm:$0x3] }
 0x1a3   : > { %v664_v24 = vsel %vm661_vm1, %v648_v35, %v656_v13  ;;  %v668_v29 = vsel %vm661_vm1, %v656_v13, %v648_v35  ;;  %v665_v31 = vsel %vm661_vm1, %v2542_v30, %v658_v14  ;;  %v669_v33 = vsel %vm661_vm1, %v658_v14, %v2542_v30 }
 0x1a4   : > { %v686_v60 = vmul.f32 %v2618_v63, %v668_v29  ;;  %v687_v62 = vmul.f32 %v2621_v1, %v664_v24  ;;  %v688_v2 = vmul.f32 %v2618_v63, %v669_v33  ;;  %v689_v3 = vmul.f32 %v2621_v1, %v665_v31  ;;  %2073 = vmatprep.subr.bf16.mxu1 %v2072_v15 }
 0x1a5   : > { %2075 = vmatpush1.bf16.msra.mxu1 %v2074_v17  ;;  %v2680_v29 = vrot.slane %v2049_v11, %v2399_v16  ;;  %v2683_v31 = vrot.slane %v2049_v11, %v2609_v59 }
 0x1a6   : > { %v699_v5 = vpop.permute.xlu0 %698  ;;  %v701_v35 = vpop.permute.xlu1 %700  ;;  %v2076_v6 = vpack.c.bf16 %v689_v3, %v687_v62  ;;  %v2078_v7 = vpack.c.bf16 %v688_v2, %v686_v60 }
 0x1a7   : > { %v707_v8 = vsel %vm706_vm2, %v691_v39, %v699_v5  ;;  %v711_v30 = vsel %vm706_vm2, %v699_v5, %v691_v39  ;;  %v708_v9 = vsel %vm706_vm2, %v2548_v32, %v701_v35  ;;  %v712_v10 = vsel %vm706_vm2, %v701_v35, %v2548_v32 }
 0x1a8   : > { %v728_v12 = vmul.f32 %v2642_v18, %v711_v30  ;;  %v729_v13 = vmul.f32 %v2645_v19, %v707_v8  ;;  %v730_v14 = vmul.f32 %v2642_v18, %v712_v10  ;;  %v731_v39 = vmul.f32 %v2645_v19, %v708_v9  ;;  %2077 = vmatprep.subr.bf16.mxu1 %v2076_v6 }
 0x1a9   : > { %2079 = vmatpush1.bf16.msra.mxu1 %v2078_v7 }
 0x1aa   : > { %v703_v15 = vpop.permute.xlu0 %702  ;;  %v705_v17 = vpop.permute.xlu1 %704  ;;  %v2080_v24 = vpack.c.bf16 %v731_v39, %v729_v13  ;;  %v2082_v32 = vpack.c.bf16 %v730_v14, %v728_v12  ;;  %v2050_v12 = vld [vmem:[%s3351_s2 + $0x3] ss:$8 sm:$0x3] }
 0x1ab   : > { %v709_v33 = vsel %vm706_vm2, %v2571_v41, %v703_v15  ;;  %v713_v60 = vsel %vm706_vm2, %v703_v15, %v2571_v41  ;;  %v710_v62 = vsel %vm706_vm2, %v2554_v34, %v705_v17  ;;  %v714_v2 = vsel %vm706_vm2, %v705_v17, %v2554_v34 }
 0x1ac   : > { %v732_v3 = vmul.f32 %v2642_v18, %v713_v60  ;;  %v733_v5 = vmul.f32 %v2645_v19, %v709_v33  ;;  %v734_v35 = vmul.f32 %v2642_v18, %v714_v2  ;;  %v735_v6 = vmul.f32 %v2645_v19, %v710_v62  ;;  %2081 = vmatprep.subr.bf16.mxu1 %v2080_v24 }
 0x1ad   : > { %2083 = vmatpush1.bf16.msra.mxu1 %v2082_v32  ;;  %v2722_v32 = vrot.slane %v2050_v12, %v2399_v16  ;;  %v2725_v33 = vrot.slane %v2050_v12, %v2609_v59 }
 0x1ae   : > { %v745_v7 = vpop.permute.xlu0 %744  ;;  %v747_v41 = vpop.permute.xlu1 %746  ;;  %v2084_v8 = vpack.c.bf16 %v735_v6, %v733_v5  ;;  %v2086_v30 = vpack.c.bf16 %v734_v35, %v732_v3 }
 0x1af   : > { %v753_v9 = vsel %vm752_vm3, %v2575_v43, %v745_v7  ;;  %v757_v34 = vsel %vm752_vm3, %v745_v7, %v2575_v43  ;;  %v754_v10 = vsel %vm752_vm3, %v2566_v38, %v747_v41  ;;  %v758_v11 = vsel %vm752_vm3, %v747_v41, %v2566_v38 }
 0x1b0   : > { %v774_v13 = vmul.f32 %v2680_v29, %v757_v34  ;;  %v775_v14 = vmul.f32 %v2683_v31, %v753_v9  ;;  %v776_v39 = vmul.f32 %v2680_v29, %v758_v11  ;;  %v777_v43 = vmul.f32 %v2683_v31, %v754_v10  ;;  %2085 = vmatprep.subr.bf16.mxu1 %v2084_v8 }
 0x1b1   : > { %2087 = vmatpush1.bf16.msra.mxu1 %v2086_v30 }
 0x1b2   : > { %v749_v15 = vpop.permute.xlu0 %748  ;;  %v751_v17 = vpop.permute.xlu1 %750  ;;  %v2088_v24 = vpack.c.bf16 %v777_v43, %v775_v14  ;;  %v2090_v38 = vpack.c.bf16 %v776_v39, %v774_v13 }
 0x1b3   : > { %v755_v60 = vsel %vm752_vm3, %v2579_v45, %v749_v15  ;;  %v759_v62 = vsel %vm752_vm3, %v749_v15, %v2579_v45  ;;  %v756_v2 = vsel %vm752_vm3, %v2569_v40, %v751_v17  ;;  %v760_v3 = vsel %vm752_vm3, %v751_v17, %v2569_v40 }
 0x1b4   : > { %v778_v5 = vmul.f32 %v2680_v29, %v759_v62  ;;  %v779_v35 = vmul.f32 %v2683_v31, %v755_v60  ;;  %v780_v6 = vmul.f32 %v2680_v29, %v760_v3  ;;  %v781_v7 = vmul.f32 %v2683_v31, %v756_v2  ;;  %2089 = vmatprep.subr.bf16.mxu1 %v2088_v24 }
 0x1b5   : > { %2091 = vmatpush1.bf16.msra.mxu1 %v2090_v38 }
 0x1b6   : > { %v791_v41 = vpop.permute.xlu0 %790  ;;  %v793_v45 = vpop.permute.xlu1 %792  ;;  %v2092_v8 = vpack.c.bf16 %v781_v7, %v779_v35  ;;  %v2094_v30 = vpack.c.bf16 %v780_v6, %v778_v5  ;;  %v2051_v7 = vld [vmem:[%s3351_s2 + $0x5] ss:$8 sm:$0x3] }
 0x1b7   : > { %v799_v9 = vsel %vm798_vm4, %v2583_v47, %v791_v41  ;;  %v803_v40 = vsel %vm798_vm4, %v791_v41, %v2583_v47  ;;  %v800_v34 = vsel %vm798_vm4, %v2573_v42, %v793_v45  ;;  %v804_v10 = vsel %vm798_vm4, %v793_v45, %v2573_v42 }
 0x1b8   : > { %v820_v11 = vmul.f32 %v2722_v32, %v803_v40  ;;  %v821_v12 = vmul.f32 %v2725_v33, %v799_v9  ;;  %v822_v13 = vmul.f32 %v2722_v32, %v804_v10  ;;  %v823_v14 = vmul.f32 %v2725_v33, %v800_v34  ;;  %2093 = vmatprep.subr.bf16.mxu1 %v2092_v8 }
 0x1b9   : > { %2095 = vmatpush1.bf16.msra.mxu1 %v2094_v30  ;;  %v2106_v8 = vpack.c.bf16 %v2410_v22, %v2402_v20  ;;  %v2792_v30 = vrot.slane %v2051_v7, %v2399_v16  ;;  %v2110_v34 = vpack.c.bf16 %v2404_v21, %v2416_v23  ;;  %v2052_v21 = vld [vmem:[%s3351_s2 + $0x6] ss:$8 sm:$0x3] }
 0x1ba   : > { %v795_v39 = vpop.permute.xlu0 %794  ;;  %v797_v47 = vpop.permute.xlu1 %796  ;;  %v2096_v43 = vpack.c.bf16 %v823_v14, %v821_v12  ;;  %v2098_v15 = vpack.c.bf16 %v822_v13, %v820_v11 }
 0x1bb   : > { %v801_v17 = vsel %vm798_vm4, %v2587_v49, %v795_v39  ;;  %v805_v42 = vsel %vm798_vm4, %v795_v39, %v2587_v49  ;;  %v802_v24 = vsel %vm798_vm4, %v2577_v44, %v797_v47  ;;  %v806_v38 = vsel %vm798_vm4, %v797_v47, %v2577_v44 }
 0x1bc   : > { %v824_v60 = vmul.f32 %v2722_v32, %v805_v42  ;;  %v825_v62 = vmul.f32 %v2725_v33, %v801_v17  ;;  %v826_v2 = vmul.f32 %v2722_v32, %v806_v38  ;;  %v827_v3 = vmul.f32 %v2725_v33, %v802_v24  ;;  %2097 = vmatprep.subr.bf16.mxu1 %v2096_v43 }
 0x1bd   : > { %2099 = vmatpush1.bf16.msra.mxu1 %v2098_v15  ;;  %v2104_v44 = vpack.c.bf16 %v2471_v26, %v2464_v25  ;;  %v2795_v25 = vrot.slane %v2051_v7, %v2609_v59  ;;  %v2108_v26 = vpack.c.bf16 %v2481_v28, %v2478_v27  ;;  %v2825_v47 = vrot.slane %v2052_v21, %v2609_v59 }
 0x1be   : > { %v2775_v5 = vpop.permute.xlu0 %966  ;;  %v2777_v49 = vpop.permute.xlu1 %968  ;;  %v2100_v35 = vpack.c.bf16 %v827_v3, %v825_v62  ;;  %v2102_v6 = vpack.c.bf16 %v826_v2, %v824_v60 }
 0x1c0   : > { %2101 = vmatprep.subr.bf16.mxu1 %v2100_v35 }
 0x1c1   : > { %2103 = vmatpush1.bf16.msra.mxu1 %v2102_v6 }
 0x1c2   : > { %v2784_v41 = vpop.permute.xlu0 %970  ;;  %v2786_v45 = vpop.permute.xlu1 %972  ;;  %2105 = vmatprep.subr.bf16.mxu1 %v2104_v44 }
 0x1c5   : > { %2107 = vmatpush1.bf16.msra.mxu1 %v2106_v8  ;;  %v2053_v8 = vld [vmem:[%s3351_s2 + $0x7] ss:$8 sm:$0x3] }
 0x1c6   : > { %v837_v9 = vpop.permute.xlu0 %836  ;;  %v839_v40 = vpop.permute.xlu1 %838  ;;  %2109 = vmatprep.subr.bf16.mxu1 %v2108_v26 }
 0x1c7   : > { %v845_v20 = vsel %vm844_vm5, %v2591_v51, %v837_v9  ;;  %v849_v22 = vsel %vm844_vm5, %v837_v9, %v2591_v51  ;;  %v846_v10 = vsel %vm844_vm5, %v2581_v46, %v839_v40  ;;  %v850_v27 = vsel %vm844_vm5, %v839_v40, %v2581_v46 }
 0x1c8   : > { %v866_v23 = vmul.f32 %v2792_v30, %v845_v20  ;;  %v867_v28 = vmul.f32 %v2795_v25, %v849_v22  ;;  %v868_v11 = vmul.f32 %v2792_v30, %v846_v10  ;;  %v869_v51 = vmul.f32 %v2795_v25, %v850_v27 }
 0x1c9   : > { %2111 = vmatpush1.bf16.msra.mxu1 %v2110_v34  ;;  %v2822_v46 = vrot.slane %v2052_v21, %v2399_v16  ;;  %v2864_v10 = vrot.slane %v2053_v8, %v2399_v16  ;;  %v2867_v27 = vrot.slane %v2053_v8, %v2609_v59 }
 0x1ca   : > { %v841_v12 = vpop.permute.xlu0 %840  ;;  %v843_v13 = vpop.permute.xlu1 %842  ;;  %v2112_v14 = vpack.c.bf16 %v869_v51, %v867_v28  ;;  %v2114_v39 = vpack.c.bf16 %v868_v11, %v866_v23 }
 0x1cb   : > { %v847_v43 = vsel %vm844_vm5, %v2595_v53, %v841_v12  ;;  %v851_v15 = vsel %vm844_vm5, %v841_v12, %v2595_v53  ;;  %v848_v17 = vsel %vm844_vm5, %v2585_v48, %v843_v13  ;;  %v852_v42 = vsel %vm844_vm5, %v843_v13, %v2585_v48 }
 0x1cc   : > { %v870_v24 = vmul.f32 %v2792_v30, %v847_v43  ;;  %v871_v38 = vmul.f32 %v2795_v25, %v851_v15  ;;  %v872_v60 = vmul.f32 %v2792_v30, %v848_v17  ;;  %v873_v62 = vmul.f32 %v2795_v25, %v852_v42  ;;  %2113 = vmatprep.subr.bf16.mxu1 %v2112_v14 }
 0x1cd   : > { %2115 = vmatpush1.bf16.msra.mxu1 %v2114_v39 }
 0x1ce   : > { %v883_v2 = vpop.permute.xlu0 %882  ;;  %v885_v53 = vpop.permute.xlu1 %884  ;;  %v2116_v3 = vpack.c.bf16 %v873_v62, %v871_v38  ;;  %v2118_v35 = vpack.c.bf16 %v872_v60, %v870_v24  ;;  %v2054_v38 = vld [vmem:[%s3351_s2 + $0x10] ss:$8 sm:$0x3] }
 0x1cf   : > { %v891_v6 = vsel %vm890_vm6, %v2599_v55, %v883_v2  ;;  %v895_v48 = vsel %vm890_vm6, %v883_v2, %v2599_v55  ;;  %v892_v44 = vsel %vm890_vm6, %v2589_v50, %v885_v53  ;;  %v896_v7 = vsel %vm890_vm6, %v885_v53, %v2589_v50 }
 0x1d0   : > { %v912_v26 = vmul.f32 %v2822_v46, %v891_v6  ;;  %v913_v9 = vmul.f32 %v2825_v47, %v895_v48  ;;  %v914_v40 = vmul.f32 %v2822_v46, %v892_v44  ;;  %v915_v55 = vmul.f32 %v2825_v47, %v896_v7  ;;  %2117 = vmatprep.subr.bf16.mxu1 %v2116_v3 }
 0x1d1   : > { %2119 = vmatpush1.bf16.msra.mxu1 %v2118_v35  ;;  %v2906_v6 = vrot.slane %v2054_v38, %v2399_v16  ;;  %v2909_v48 = vrot.slane %v2054_v38, %v2609_v59 }
 0x1d2   : > { %v887_v34 = vpop.permute.xlu0 %886  ;;  %v889_v20 = vpop.permute.xlu1 %888  ;;  %v2120_v22 = vpack.c.bf16 %v915_v55, %v913_v9  ;;  %v2122_v50 = vpack.c.bf16 %v914_v40, %v912_v26 }
 0x1d3   : > { %v893_v21 = vsel %vm890_vm6, %v2606_v58, %v887_v34  ;;  %v897_v23 = vsel %vm890_vm6, %v887_v34, %v2606_v58  ;;  %v894_v28 = vsel %vm890_vm6, %v2593_v52, %v889_v20  ;;  %v898_v11 = vsel %vm890_vm6, %v889_v20, %v2593_v52 }
 0x1d4   : > { %v916_v51 = vmul.f32 %v2822_v46, %v893_v21  ;;  %v917_v12 = vmul.f32 %v2825_v47, %v897_v23  ;;  %v918_v13 = vmul.f32 %v2822_v46, %v894_v28  ;;  %v919_v14 = vmul.f32 %v2825_v47, %v898_v11  ;;  %2121 = vmatprep.subr.bf16.mxu1 %v2120_v22 }
 0x1d5   : > { %2123 = vmatpush1.bf16.msra.mxu1 %v2122_v50 }
 0x1d6   : > { %v929_v39 = vpop.permute.xlu0 %928  ;;  %v931_v58 = vpop.permute.xlu1 %930  ;;  %v2124_v43 = vpack.c.bf16 %v919_v14, %v917_v12  ;;  %v2126_v15 = vpack.c.bf16 %v918_v13, %v916_v51 }
 0x1d7   : > { %v937_v17 = vsel %vm936_vm7, %v2614_v61, %v929_v39  ;;  %v941_v52 = vsel %vm936_vm7, %v929_v39, %v2614_v61  ;;  %v938_v42 = vsel %vm936_vm7, %v2597_v54, %v931_v58  ;;  %v942_v24 = vsel %vm936_vm7, %v931_v58, %v2597_v54 }
 0x1d8   : > { %v958_v60 = vmul.f32 %v2864_v10, %v937_v17  ;;  %v959_v62 = vmul.f32 %v2867_v27, %v941_v52  ;;  %v960_v2 = vmul.f32 %v2864_v10, %v938_v42  ;;  %v961_v61 = vmul.f32 %v2867_v27, %v942_v24  ;;  %2125 = vmatprep.subr.bf16.mxu1 %v2124_v43 }
 0x1d9   : > { %2127 = vmatpush1.bf16.msra.mxu1 %v2126_v15 }
 0x1da   : > { %v933_v53 = vpop.permute.xlu0 %932  ;;  %v935_v3 = vpop.permute.xlu1 %934  ;;  %v2128_v35 = vpack.c.bf16 %v961_v61, %v959_v62  ;;  %v2130_v54 = vpack.c.bf16 %v960_v2, %v958_v60 }
 0x1db   : > { %v939_v44 = vsel %vm936_vm7, %v2627_v4, %v933_v53  ;;  %v943_v7 = vsel %vm936_vm7, %v933_v53, %v2627_v4  ;;  %v940_v8 = vsel %vm936_vm7, %v2604_v57, %v935_v3  ;;  %v944_v16 = vsel %vm936_vm7, %v935_v3, %v2604_v57 }
 0x1dc   : > { %v962_v26 = vmul.f32 %v2864_v10, %v939_v44  ;;  %v963_v59 = vmul.f32 %v2867_v27, %v943_v7  ;;  %v964_v9 = vmul.f32 %v2864_v10, %v940_v8  ;;  %v965_v40 = vmul.f32 %v2867_v27, %v944_v16  ;;  %2129 = vmatprep.subr.bf16.mxu1 %v2128_v35 }
 0x1dd   : > { %2131 = vmatpush1.bf16.msra.mxu1 %v2130_v54 }
 0x1de   : > { %v975_v55 = vpop.permute.xlu0 %974  ;;  %v977_v4 = vpop.permute.xlu1 %976  ;;  %v2132_v34 = vpack.c.bf16 %v965_v40, %v963_v59  ;;  %v2134_v20 = vpack.c.bf16 %v964_v9, %v962_v26 }
 0x1df   : > { %v983_v22 = vsel %vm982_vm8, %v2775_v5, %v975_v55  ;;  %v987_v57 = vsel %vm982_vm8, %v975_v55, %v2775_v5  ;;  %v984_v50 = vsel %vm982_vm8, %v2777_v49, %v977_v4  ;;  %v988_v21 = vsel %vm982_vm8, %v977_v4, %v2777_v49  ;;  %v640_v5 = vld [vmem:[%s3352_s3] sm:$0xff] }
 0x1e0   : > { %v1004_v23 = vmul.f32 %v2906_v6, %v983_v22  ;;  %v1005_v28 = vmul.f32 %v2909_v48, %v987_v57  ;;  %v1006_v11 = vmul.f32 %v2906_v6, %v984_v50  ;;  %v1007_v51 = vmul.f32 %v2909_v48, %v988_v21  ;;  %2133 = vmatprep.subr.bf16.mxu1 %v2132_v34 }
 0x1e1   : > { %2135 = vmatpush1.bf16.msra.mxu1 %v2134_v20  ;;  %v2291_v22 = vmov 1  }
 0x1e2   : > { %v2138_v12 = vpack.c.bf16 %v1006_v11, %v1004_v23  ;;  %v979_v13 = vpop.permute.xlu0 %978  ;;  %v981_v14 = vpop.permute.xlu1 %980  ;;  %v2136_v39 = vpack.c.bf16 %v1007_v51, %v1005_v28  ;;  %2249 = vset.pattern.permute.xlu0 %v2291_v22 }
 0x1e3   : > { %v985_v49 = vsel %vm982_vm8, %v2784_v41, %v979_v13  ;;  %v989_v58 = vsel %vm982_vm8, %v979_v13, %v2784_v41  ;;  %v986_v43 = vsel %vm982_vm8, %v2786_v45, %v981_v14  ;;  %v990_v15 = vsel %vm982_vm8, %v981_v14, %v2786_v45  ;;  %v642_v45 = vld [vmem:[%s3352_s3 + $0x10] sm:$0xff] }
 0x1e4   : > { %v1008_v17 = vmul.f32 %v2906_v6, %v985_v49  ;;  %v1009_v52 = vmul.f32 %v2909_v48, %v989_v58  ;;  %v1010_v42 = vmul.f32 %v2906_v6, %v986_v43  ;;  %v1011_v24 = vmul.f32 %v2909_v48, %v990_v15  ;;  %1085 = vmatmul.mubr.f32.vlgmr.msra.gmra.mrb[0].mxu1 %v640_v5 }
 0x1e5   : > { %2137 = vmatprep.subr.bf16.mxu1 %v2136_v39  ;;  %1155 = vmatprep.mubr.f32.mxu1 %v2281_v0  ;;  %v2292_v14 = vmov 2  }
 0x1e6   : > { %v2142_v41 = vpack.c.bf16 %v1010_v42, %v1008_v17  ;;  %2139 = vmatpush1.bf16.msra.mxu1 %v2138_v12  ;;  %v2140_v38 = vpack.c.bf16 %v1011_v24, %v1009_v52  ;;  %2250 = vset.pattern.permute.xlu1 %v2292_v14 }
 0x1e8   : > { %2141 = vmatprep.subr.bf16.mxu1 %v2140_v38 }
 0x1ea   : > { %2143 = vmatpush1.bf16.msra.mxu1 %v2142_v41 }
 0x1ed   : > { %2055 = vmatmul.mubr.msk.f32.vlgmr.msra.gmra.mrb[0].mxu1 %vm548_vm0, %v642_v45 }
 0x1f3   : > { %v1015_v60 = vpop.permute.xlu0 %1014 }
 0x2c0   : > { %v1157_v62 = vpop.f32.mrb[0].mxu1 }
 0x2c1   : > { %v2208_v2 = vadd.f32 %v1157_v62, %v1015_v60  ;;  %v1159_v61 = vpop.f32.mrb[1].mxu1 }
 0x2c2   : > { %v2209_v53 = vadd.f32 %v1159_v61, %v1015_v60 }
 0x2c4   : > { %v1162_v3 = vadd.f32 %v2209_v53, %v2208_v2 }
 0x2c6   : > { %1163 = vadd.xlane.f32.xlu1 %v1162_v3 }
 0x353   : > { %v1164_v35 = vpop.xlane.xlu1 %1163 }
 0x354   : > { %v1165_v54 = vrot.slane %v1164_v35, 4 }
 0x356   : > { %v1166_v44 = vadd.f32 %v1165_v54, %v1164_v35 }
 0x358   : > { %v1167_v7 = vrot.slane %v1166_v44, 2 }
 0x35a   : > { %v1168_v8 = vadd.f32 %v1167_v7, %v1166_v44 }
 0x35c   : > { %v1169_v16 = vrot.slane %v1168_v8, 1 }
 0x35e   : > { %v1170_v26 = vadd.f32 %v1169_v16, %v1168_v8 }
 0x360   : > { %2212 = vpush %v1170_v26 }
 0x391   : > { %s2213_s19 = spop %2212 }
 0x392   : > { %v1172_v59 = vstv %s2213_s19 }
 0x393   : > { %v1174_v9 = vmul.f32 0.00048828125, %v1172_v59 }
 0x395   : > { %v1175_v40 = vsub.f32 %v2208_v2, %v1174_v9  ;;  %v1176_v55 = vsub.f32 %v2209_v53, %v1174_v9 }
 0x397   : > { %v1177_v4 = vmul.f32 %v1175_v40, %v1175_v40  ;;  %v1178_v34 = vmul.f32 %v1176_v55, %v1176_v55 }
 0x399   : > { %v1179_v20 = vadd.f32 %v1178_v34, %v1177_v4 }
 0x39b   : > { %1180 = vadd.xlane.f32.xlu0 %v1179_v20 }
 0x428   : > { %v1181_v57 = vpop.xlane.xlu0 %1180 }
 0x429   : > { %v1182_v50 = vrot.slane %v1181_v57, 4 }
 0x42b   : > { %v1183_v21 = vadd.f32 %v1182_v50, %v1181_v57 }
 0x42d   : > { %v1184_v23 = vrot.slane %v1183_v21, 2 }
 0x42f   : > { %v1185_v28 = vadd.f32 %v1184_v23, %v1183_v21 }
 0x431   : > { %v1186_v11 = vrot.slane %v1185_v28, 1 }
 0x433   : > { %v1187_v51 = vadd.f32 %v1186_v11, %v1185_v28 }
 0x435   : > { %2214 = vpush %v1187_v51 }
 0x466   : > { %s2215_s20 = spop %2214 }
 0x467   : > { %v1189_v5 = vstv %s2215_s20 }
 0x468   : > { %v1190_v12 = vmul.f32 0.00048828125, %v1189_v5 }
 0x46a   : > { %v1191_v13 = vadd.f32 1e-05, %v1190_v12 }
 0x46c   : > { %2261 = vrsqrt.f32 %v1191_v13 }
 0x476   : > { %v2262_v39 = vpop.eup %2261 }
 0x477   : > { %v1193_v49 = vmul.f32 %v2262_v39, %v2564_v37 }
 0x479   : > { %1202 = vperm.xlu0 %2249, %v1193_v49   ;;  %v1194_v58 = vmul.f32 %v1193_v49, %v1174_v9 }
 0x47b   : > { %1196 = vrot.lane.b32.xlu1 %v1194_v58, %s2285_s27 }
 0x47d   : > { %2253 = vset.pattern.permute.xlu0 %v2292_v14 }
 0x4ed   : > { %v1197_v43 = vpop.permute.xlu1 %1196 }
 0x4ee   : > { %v1199_v15 = vsub.f32 %v2564_v37, %v1197_v43  ;;  %v3013_v37 = vld [vmem:[%s3355_s6] sm:$0xff] }
 0x4f0   : > { %1209 = vperm.xlu1 %2250, %v1199_v15  }
 0x4f4   : > { %2251 = vset.pattern.permute.xlu1 %v2290_v36 }
 0x4f8   : > { %v1203_v17 = vpop.permute.xlu0 %1202 }
 0x4f9   : > { %v1205_v52 = vmul.f32 %v2208_v2, %v1203_v17  ;;  %v1206_v42 = vmul.f32 %v2209_v53, %v1203_v17 }
 0x56f   : > { %v1210_v24 = vpop.permute.xlu1 %1209 }
 0x570   : > { %v1212_v41 = vadd.f32 %v1210_v24, %v1205_v52  ;;  %v1213_v38 = vadd.f32 %v1210_v24, %v1206_v42 }
 0x572   : > { %v2974_v45 = vmax.f32 %v1212_v41, 0.0  ;;  %v2976_v60 = vmax.f32 %v1213_v38, 0.0 }
 0x574   : > { %1244 = vrot.lane.b32.xlu0 %v2976_v60, %s2285_s27  ;;  %1218 = vrot.lane.b32.xlu1 %v2974_v45, %s2282_s23 }
 0x578   : > { %1252 = vrot.lane.b32.xlu0 %v2976_v60, %s2286_s29  ;;  %1220 = vrot.lane.b32.xlu1 %v2976_v60, %s2282_s23 }
 0x57c   : > { %1260 = vrot.lane.b32.xlu0 %v2976_v60, %s2287_s30  ;;  %1226 = vrot.lane.b32.xlu1 %v2974_v45, %s2283_s24 }
 0x580   : > { %1268 = vrot.lane.b32.xlu0 %v2976_v60, %s2288_s14  ;;  %1228 = vrot.lane.b32.xlu1 %v2976_v60, %s2283_s24 }
 0x584   : > { %1276 = vrot.lane.b32.xlu0 %v2976_v60, %s2289_s15  ;;  %1234 = vrot.lane.b32.xlu1 %v2974_v45, %s2284_s26 }
 0x588   : > { %1236 = vrot.lane.b32.xlu1 %v2976_v60, %s2284_s26 }
 0x58c   : > { %1242 = vrot.lane.b32.xlu1 %v2974_v45, %s2285_s27 }
 0x590   : > { %1250 = vrot.lane.b32.xlu1 %v2974_v45, %s2286_s29 }
 0x594   : > { %1258 = vrot.lane.b32.xlu1 %v2974_v45, %s2287_s30 }
 0x598   : > { %1266 = vrot.lane.b32.xlu1 %v2974_v45, %s2288_s14 }
 0x59c   : > { %1274 = vrot.lane.b32.xlu1 %v2974_v45, %s2289_s15 }
 0x5a0   : > { %1284 = vperm.xlu1 %2251, %v3013_v37  }
 0x5a4   : > { %2252 = vset.pattern.permute.xlu1 %v2291_v22 }
 0x5e6   : > { %v1219_v62 = vpop.permute.xlu1 %1218  ;;  %v1245_v59 = vpop.permute.xlu0 %1244 }
 0x5ea   : > { %v1221_v2 = vpop.permute.xlu1 %1220  ;;  %v1253_v34 = vpop.permute.xlu0 %1252 }
 0x5eb   : > { %v1222_v53 = vsel %vm661_vm1, %v1219_v62, %v1221_v2  ;;  %v1223_v3 = vsel %vm661_vm1, %v1221_v2, %v1219_v62 }
 0x5ec   : > { %v1224_v7 = vmul.f32 %v1223_v3, %v2618_v63  ;;  %v1225_v8 = vmul.f32 %v1222_v53, %v2621_v1 }
 0x5ee   : > { %v1227_v61 = vpop.permute.xlu1 %1226  ;;  %v1261_v12 = vpop.permute.xlu0 %1260 }
 0x5f2   : > { %v1229_v35 = vpop.permute.xlu1 %1228  ;;  %v1269_v41 = vpop.permute.xlu0 %1268 }
 0x5f3   : > { %v1230_v54 = vsel %vm706_vm2, %v1227_v61, %v1229_v35  ;;  %v1231_v44 = vsel %vm706_vm2, %v1229_v35, %v1227_v61 }
 0x5f4   : > { %v1232_v16 = vmul.f32 %v1231_v44, %v2642_v18  ;;  %v1233_v26 = vmul.f32 %v1230_v54, %v2645_v19 }
 0x5f6   : > { %v2146_v9 = vpack.c.bf16 %v1232_v16, %v1224_v7  ;;  %v1235_v40 = vpop.permute.xlu1 %1234  ;;  %v2144_v55 = vpack.c.bf16 %v1233_v26, %v1225_v8  ;;  %v1277_v54 = vpop.permute.xlu0 %1276 }
 0x5f8   : > { %2145 = vmatprep.subr.bf16.mxu0 %v2144_v55 }
 0x5f9   : > { %2147 = vmatpush1.bf16.msra.mxu0 %v2146_v9 }
 0x5fa   : > { %v1237_v4 = vpop.permute.xlu1 %1236 }
 0x5fb   : > { %v1238_v20 = vsel %vm752_vm3, %v1235_v40, %v1237_v4  ;;  %v1239_v57 = vsel %vm752_vm3, %v1237_v4, %v1235_v40  ;;  %v1217_v40 = vld [vmem:[%s3354_s5] sm:$0xff] }
 0x5fc   : > { %v1240_v28 = vmul.f32 %v1239_v57, %v2680_v29  ;;  %v1241_v11 = vmul.f32 %v1238_v20, %v2683_v31 }
 0x5fe   : > { %v1243_v50 = vpop.permute.xlu1 %1242 }
 0x5ff   : > { %v1246_v21 = vsel %vm798_vm4, %v1243_v50, %v1245_v59  ;;  %v1247_v23 = vsel %vm798_vm4, %v1245_v59, %v1243_v50 }
 0x600   : > { %v1248_v51 = vmul.f32 %v1247_v23, %v2722_v32  ;;  %v1249_v5 = vmul.f32 %v1246_v21, %v2725_v33 }
 0x602   : > { %v2150_v13 = vpack.c.bf16 %v1248_v51, %v1240_v28  ;;  %v1251_v39 = vpop.permute.xlu1 %1250  ;;  %v2148_v49 = vpack.c.bf16 %v1249_v5, %v1241_v11 }
 0x603   : > { %v1254_v58 = vsel %vm844_vm5, %v1251_v39, %v1253_v34  ;;  %v1255_v43 = vsel %vm844_vm5, %v1253_v34, %v1251_v39 }
 0x604   : > { %v1256_v15 = vmul.f32 %v1254_v58, %v2792_v30  ;;  %v1257_v17 = vmul.f32 %v1255_v43, %v2795_v25  ;;  %2149 = vmatprep.subr.bf16.mxu0 %v2148_v49 }
 0x605   : > { %2151 = vmatpush1.bf16.msra.mxu0 %v2150_v13 }
 0x606   : > { %v2154_v52 = vpack.c.bf16 %v1256_v15, %v2974_v45  ;;  %v1259_v42 = vpop.permute.xlu1 %1258  ;;  %v2152_v24 = vpack.c.bf16 %v1257_v17, %v2976_v60 }
 0x607   : > { %v1262_v38 = vsel %vm890_vm6, %v1259_v42, %v1261_v12  ;;  %v1263_v62 = vsel %vm890_vm6, %v1261_v12, %v1259_v42 }
 0x608   : > { %2153 = vmatprep.subr.bf16.mxu0 %v2152_v24  ;;  %v1264_v45 = vmul.f32 %v1262_v38, %v2822_v46  ;;  %v1265_v60 = vmul.f32 %v1263_v62, %v2825_v47 }
 0x609   : > { %2155 = vmatpush1.bf16.msra.mxu0 %v2154_v52 }
 0x60a   : > { %v1267_v2 = vpop.permute.xlu1 %1266 }
 0x60b   : > { %v1270_v61 = vsel %vm936_vm7, %v1267_v2, %v1269_v41  ;;  %v1271_v53 = vsel %vm936_vm7, %v1269_v41, %v1267_v2 }
 0x60c   : > { %v1272_v3 = vmul.f32 %v1270_v61, %v2864_v10  ;;  %v1273_v35 = vmul.f32 %v1271_v53, %v2867_v27 }
 0x60e   : > { %v2158_v44 = vpack.c.bf16 %v1272_v3, %v1264_v45  ;;  %v1275_v7 = vpop.permute.xlu1 %1274  ;;  %v2156_v8 = vpack.c.bf16 %v1273_v35, %v1265_v60 }
 0x60f   : > { %v1279_v16 = vsel %vm982_vm8, %v1277_v54, %v1275_v7  ;;  %v1278_v26 = vsel %vm982_vm8, %v1275_v7, %v1277_v54 }
 0x610   : > { %v1281_v59 = vmul.f32 %v1279_v16, %v2909_v48  ;;  %2157 = vmatprep.subr.bf16.mxu0 %v2156_v8  ;;  %v1280_v9 = vmul.f32 %v1278_v26, %v2906_v6 }
 0x611   : > { %2159 = vmatpush1.bf16.msra.mxu0 %v2158_v44 }
 0x612   : > { %1307 = vmatprep.subr.mxu0 %v1281_v59 }
 0x615   : > { %1308 = vmatpush1.msra.mxu0 %v1280_v9 }
 0x616   : > { %2056 = vmatmul.mubr.msk.f32.vlgmr.msra.gmra.mrb[2].mxu0 %vm1287_vm9, %v1217_v40 }
 0x617   : > { %1553 = vmatprep.mubr.f32.mxu0 %v2281_v0 }
 0x61f   : > { %v1285_v55 = vpop.permute.xlu1 %1284 }
 0x6e9   : > { %v1357_v4 = vpop.f32.mrb[2].mxu0 }
 0x6ea   : > { %v1359_v34 = vpop.f32.mrb[3].mxu0  ;;  %v1358_v20 = vadd.f32 %v1357_v4, %v1285_v55 }
 0x6eb   : > { %v1360_v57 = vadd.f32 %v1359_v34, %v1285_v55 }
 0x6ed   : > { %v1362_v50 = vadd.f32 %v1360_v57, %v1358_v20 }
 0x6ef   : > { %1363 = vadd.xlane.f32.xlu0 %v1362_v50 }
 0x77c   : > { %v1364_v21 = vpop.xlane.xlu0 %1363 }
 0x77d   : > { %v1365_v23 = vrot.slane %v1364_v21, 4 }
 0x77f   : > { %v1366_v28 = vadd.f32 %v1365_v23, %v1364_v21 }
 0x781   : > { %v1367_v11 = vrot.slane %v1366_v28, 2 }
 0x783   : > { %v1368_v51 = vadd.f32 %v1367_v11, %v1366_v28 }
 0x785   : > { %v1369_v5 = vrot.slane %v1368_v51, 1 }
 0x787   : > { %v1370_v12 = vadd.f32 %v1369_v5, %v1368_v51 }
 0x789   : > { %2216 = vpush %v1370_v12 }
 0x7ba   : > { %s2217_s18 = spop %2216 }
 0x7bb   : > { %v1372_v13 = vstv %s2217_s18 }
 0x7bc   : > { %v1373_v39 = vmul.f32 0.00048828125, %v1372_v13 }
 0x7be   : > { %v1374_v49 = vsub.f32 %v1358_v20, %v1373_v39  ;;  %v1375_v58 = vsub.f32 %v1360_v57, %v1373_v39 }
 0x7c0   : > { %v1376_v43 = vmul.f32 %v1374_v49, %v1374_v49  ;;  %v1377_v15 = vmul.f32 %v1375_v58, %v1375_v58 }
 0x7c2   : > { %v1378_v17 = vadd.f32 %v1377_v15, %v1376_v43 }
 0x7c4   : > { %1379 = vadd.xlane.f32.xlu1 %v1378_v17 }
 0x851   : > { %v1380_v52 = vpop.xlane.xlu1 %1379 }
 0x852   : > { %v1381_v42 = vrot.slane %v1380_v52, 4 }
 0x854   : > { %v1382_v24 = vadd.f32 %v1381_v42, %v1380_v52 }
 0x856   : > { %v1383_v41 = vrot.slane %v1382_v24, 2 }
 0x858   : > { %v1384_v38 = vadd.f32 %v1383_v41, %v1382_v24 }
 0x85a   : > { %v1385_v62 = vrot.slane %v1384_v38, 1 }
 0x85c   : > { %v1386_v2 = vadd.f32 %v1385_v62, %v1384_v38 }
 0x85e   : > { %2218 = vpush %v1386_v2 }
 0x88f   : > { %s2219_s19 = spop %2218 }
 0x890   : > { %v1388_v61 = vstv %s2219_s19 }
 0x891   : > { %v1389_v53 = vmul.f32 0.00048828125, %v1388_v61 }
 0x893   : > { %v1390_v45 = vadd.f32 1e-05, %v1389_v53 }
 0x895   : > { %2263 = vrsqrt.f32 %v1390_v45 }
 0x89f   : > { %v2264_v60 = vpop.eup %2263 }
 0x8a0   : > { %v1392_v3 = vmul.f32 %v2264_v60, %v3013_v37 }
 0x8a2   : > { %1401 = vperm.xlu1 %2252, %v1392_v3   ;;  %v1393_v35 = vmul.f32 %v1392_v3, %v1373_v39 }
 0x8a4   : > { %1395 = vrot.lane.b32.xlu0 %v1393_v35, %s2285_s27 }
 0x8a6   : > { %2256 = vset.pattern.permute.xlu1 %v2292_v14 }
 0x916   : > { %v1396_v54 = vpop.permute.xlu0 %1395 }
 0x917   : > { %v1398_v44 = vsub.f32 %v3013_v37, %v1396_v54  ;;  %v3104_v37 = vld [vmem:[%s3357_s8] sm:$0xff] }
 0x919   : > { %1408 = vperm.xlu0 %2253, %v1398_v44  }
 0x91d   : > { %2254 = vset.pattern.permute.xlu0 %v2290_v36 }
 0x921   : > { %v1402_v7 = vpop.permute.xlu1 %1401 }
 0x922   : > { %v1404_v8 = vmul.f32 %v1402_v7, %v1358_v20  ;;  %v1405_v26 = vmul.f32 %v1402_v7, %v1360_v57 }
 0x998   : > { %v1409_v16 = vpop.permute.xlu0 %1408 }
 0x999   : > { %v1411_v59 = vadd.f32 %v1409_v16, %v1404_v8  ;;  %v1412_v9 = vadd.f32 %v1409_v16, %v1405_v26 }
 0x99b   : > { %v3077_v40 = vmax.f32 %v1411_v59, 0.0  ;;  %v1414_v14 = vmax.f32 %v1412_v9, 0.0 }
 0x99d   : > { %1425 = vrot.lane.b32.xlu0 %v3077_v40, %s2283_s24  ;;  %1417 = vrot.lane.b32.xlu1 %v3077_v40, %s2282_s23 }
 0x9a1   : > { %1433 = vrot.lane.b32.xlu0 %v3077_v40, %s2284_s26  ;;  %1419 = vrot.lane.b32.xlu1 %v1414_v14, %s2282_s23 }
 0x9a5   : > { %1441 = vrot.lane.b32.xlu0 %v3077_v40, %s2285_s27  ;;  %1427 = vrot.lane.b32.xlu1 %v1414_v14, %s2283_s24 }
 0x9a9   : > { %1449 = vrot.lane.b32.xlu0 %v3077_v40, %s2286_s29  ;;  %1435 = vrot.lane.b32.xlu1 %v1414_v14, %s2284_s26 }
 0x9ad   : > { %1457 = vrot.lane.b32.xlu0 %v3077_v40, %s2287_s30  ;;  %1443 = vrot.lane.b32.xlu1 %v1414_v14, %s2285_s27 }
 0x9b1   : > { %1465 = vrot.lane.b32.xlu0 %v3077_v40, %s2288_s14  ;;  %1451 = vrot.lane.b32.xlu1 %v1414_v14, %s2286_s29 }
 0x9b5   : > { %1473 = vrot.lane.b32.xlu0 %v3077_v40, %s2289_s15  ;;  %1459 = vrot.lane.b32.xlu1 %v1414_v14, %s2287_s30 }
 0x9b9   : > { %1467 = vrot.lane.b32.xlu1 %v1414_v14, %s2288_s14  ;;  %1483 = vperm.xlu0 %2254, %v3104_v37  }
 0x9bd   : > { %1475 = vrot.lane.b32.xlu1 %v1414_v14, %s2289_s15  ;;  %2255 = vset.pattern.permute.xlu0 %v2291_v22 }
 0xa0f   : > { %v1426_v55 = vpop.permute.xlu0 %1425  ;;  %v1418_v4 = vpop.permute.xlu1 %1417 }
 0xa13   : > { %v1434_v34 = vpop.permute.xlu0 %1433  ;;  %v1420_v20 = vpop.permute.xlu1 %1419 }
 0xa14   : > { %v1421_v57 = vsel %vm661_vm1, %v1418_v4, %v1420_v20  ;;  %v1422_v50 = vsel %vm661_vm1, %v1420_v20, %v1418_v4 }
 0xa15   : > { %v1423_v51 = vmul.f32 %v1422_v50, %v2618_v63  ;;  %v1424_v5 = vmul.f32 %v1421_v57, %v2621_v1 }
 0xa17   : > { %v1442_v21 = vpop.permute.xlu0 %1441  ;;  %v1428_v23 = vpop.permute.xlu1 %1427 }
 0xa18   : > { %v1429_v28 = vsel %vm706_vm2, %v1426_v55, %v1428_v23  ;;  %v1430_v11 = vsel %vm706_vm2, %v1428_v23, %v1426_v55 }
 0xa19   : > { %v1431_v12 = vmul.f32 %v1430_v11, %v2642_v18  ;;  %v1432_v13 = vmul.f32 %v1429_v28, %v2645_v19 }
 0xa1b   : > { %v2162_v39 = vpack.c.bf16 %v1431_v12, %v1423_v51  ;;  %v1436_v49 = vpop.permute.xlu1 %1435  ;;  %v2160_v58 = vpack.c.bf16 %v1432_v13, %v1424_v5  ;;  %v1450_v43 = vpop.permute.xlu0 %1449  ;;  %v1416_v13 = vld [vmem:[%s3356_s7] sm:$0xff] }
 0xa1c   : > { %v1437_v15 = vsel %vm752_vm3, %v1434_v34, %v1436_v49  ;;  %v1438_v17 = vsel %vm752_vm3, %v1436_v49, %v1434_v34 }
 0xa1d   : > { %2161 = vmatprep.subr.bf16.mxu0 %v2160_v58  ;;  %v1439_v41 = vmul.f32 %v1438_v17, %v2680_v29  ;;  %v1440_v38 = vmul.f32 %v1437_v15, %v2683_v31 }
 0xa1e   : > { %2163 = vmatpush1.bf16.msra.mxu0 %v2162_v39 }
 0xa1f   : > { %v1444_v52 = vpop.permute.xlu1 %1443  ;;  %v1458_v61 = vpop.permute.xlu0 %1457 }
 0xa20   : > { %v1445_v42 = vsel %vm798_vm4, %v1442_v21, %v1444_v52  ;;  %v1446_v24 = vsel %vm798_vm4, %v1444_v52, %v1442_v21 }
 0xa21   : > { %v1447_v62 = vmul.f32 %v1446_v24, %v2722_v32  ;;  %v1448_v2 = vmul.f32 %v1445_v42, %v2725_v33 }
 0xa23   : > { %v2166_v53 = vpack.c.bf16 %v1447_v62, %v1439_v41  ;;  %v1452_v45 = vpop.permute.xlu1 %1451  ;;  %v2164_v60 = vpack.c.bf16 %v1448_v2, %v1440_v38  ;;  %v1466_v26 = vpop.permute.xlu0 %1465 }
 0xa24   : > { %v1453_v3 = vsel %vm844_vm5, %v1450_v43, %v1452_v45  ;;  %v1454_v35 = vsel %vm844_vm5, %v1452_v45, %v1450_v43 }
 0xa25   : > { %v1455_v54 = vmul.f32 %v1453_v3, %v2792_v30  ;;  %v1456_v44 = vmul.f32 %v1454_v35, %v2795_v25  ;;  %2165 = vmatprep.subr.bf16.mxu0 %v2164_v60 }
 0xa26   : > { %2167 = vmatpush1.bf16.msra.mxu0 %v2166_v53 }
 0xa27   : > { %v2170_v7 = vpack.c.bf16 %v1455_v54, %v3077_v40  ;;  %v1460_v8 = vpop.permute.xlu1 %1459  ;;  %v2168_v16 = vpack.c.bf16 %v1456_v44, %v1414_v14  ;;  %v1474_v50 = vpop.permute.xlu0 %1473 }
 0xa28   : > { %v1461_v59 = vsel %vm890_vm6, %v1458_v61, %v1460_v8  ;;  %v1462_v9 = vsel %vm890_vm6, %v1460_v8, %v1458_v61 }
 0xa29   : > { %2169 = vmatprep.subr.bf16.mxu0 %v2168_v16  ;;  %v1463_v40 = vmul.f32 %v1461_v59, %v2822_v46  ;;  %v1464_v14 = vmul.f32 %v1462_v9, %v2825_v47 }
 0xa2a   : > { %2171 = vmatpush1.bf16.msra.mxu0 %v2170_v7 }
 0xa2b   : > { %v1468_v55 = vpop.permute.xlu1 %1467 }
 0xa2c   : > { %v1469_v4 = vsel %vm936_vm7, %v1466_v26, %v1468_v55  ;;  %v1470_v34 = vsel %vm936_vm7, %v1468_v55, %v1466_v26 }
 0xa2d   : > { %v1471_v20 = vmul.f32 %v1469_v4, %v2864_v10  ;;  %v1472_v57 = vmul.f32 %v1470_v34, %v2867_v27 }
 0xa2f   : > { %v2174_v21 = vpack.c.bf16 %v1471_v20, %v1463_v40  ;;  %v1476_v23 = vpop.permute.xlu1 %1475  ;;  %v2172_v28 = vpack.c.bf16 %v1472_v57, %v1464_v14 }
 0xa30   : > { %v1478_v11 = vsel %vm982_vm8, %v1476_v23, %v1474_v50  ;;  %v1477_v51 = vsel %vm982_vm8, %v1474_v50, %v1476_v23 }
 0xa31   : > { %v1480_v5 = vmul.f32 %v1478_v11, %v2909_v48  ;;  %2173 = vmatprep.subr.bf16.mxu0 %v2172_v28  ;;  %v1479_v12 = vmul.f32 %v1477_v51, %v2906_v6 }
 0xa32   : > { %2175 = vmatpush1.bf16.msra.mxu0 %v2174_v21 }
 0xa33   : > { %1505 = vmatprep.subr.mxu0 %v1480_v5 }
 0xa36   : > { %1506 = vmatpush1.msra.mxu0 %v1479_v12 }
 0xa37   : > { %2057 = vmatmul.mubr.msk.f32.vlgmr.msra.gmra.mrb[4].mxu0 %vm1287_vm9, %v1416_v13 }
 0xa38   : > { %1751 = vmatprep.mubr.f32.mxu0 %v2281_v0  ;;  %v1484_v39 = vpop.permute.xlu0 %1483 }
 0xb0a   : > { %v1555_v49 = vpop.f32.mrb[4].mxu0 }
 0xb0b   : > { %v1556_v58 = vadd.f32 %v1555_v49, %v1484_v39  ;;  %v1557_v43 = vpop.f32.mrb[5].mxu0 }
 0xb0c   : > { %v1558_v15 = vadd.f32 %v1557_v43, %v1484_v39 }
 0xb0e   : > { %v1560_v17 = vadd.f32 %v1558_v15, %v1556_v58 }
 0xb10   : > { %1561 = vadd.xlane.f32.xlu1 %v1560_v17 }
 0xb9d   : > { %v1562_v52 = vpop.xlane.xlu1 %1561 }
 0xb9e   : > { %v1563_v42 = vrot.slane %v1562_v52, 4 }
 0xba0   : > { %v1564_v24 = vadd.f32 %v1563_v42, %v1562_v52 }
 0xba2   : > { %v1565_v41 = vrot.slane %v1564_v24, 2 }
 0xba4   : > { %v1566_v38 = vadd.f32 %v1565_v41, %v1564_v24 }
 0xba6   : > { %v1567_v62 = vrot.slane %v1566_v38, 1 }
 0xba8   : > { %v1568_v2 = vadd.f32 %v1567_v62, %v1566_v38 }
 0xbaa   : > { %2220 = vpush %v1568_v2 }
 0xbdb   : > { %s2221_s17 = spop %2220 }
 0xbdc   : > { %v1570_v61 = vstv %s2221_s17 }
 0xbdd   : > { %v1571_v53 = vmul.f32 0.00048828125, %v1570_v61 }
 0xbdf   : > { %v1572_v45 = vsub.f32 %v1556_v58, %v1571_v53  ;;  %v1573_v60 = vsub.f32 %v1558_v15, %v1571_v53 }
 0xbe1   : > { %v1574_v3 = vmul.f32 %v1572_v45, %v1572_v45  ;;  %v1575_v35 = vmul.f32 %v1573_v60, %v1573_v60 }
 0xbe3   : > { %v1576_v54 = vadd.f32 %v1575_v35, %v1574_v3 }
 0xbe5   : > { %1577 = vadd.xlane.f32.xlu0 %v1576_v54 }
 0xc72   : > { %v1578_v44 = vpop.xlane.xlu0 %1577 }
 0xc73   : > { %v1579_v7 = vrot.slane %v1578_v44, 4 }
 0xc75   : > { %v1580_v8 = vadd.f32 %v1579_v7, %v1578_v44 }
 0xc77   : > { %v1581_v16 = vrot.slane %v1580_v8, 2 }
 0xc79   : > { %v1582_v26 = vadd.f32 %v1581_v16, %v1580_v8 }
 0xc7b   : > { %v1583_v59 = vrot.slane %v1582_v26, 1 }
 0xc7d   : > { %v1584_v9 = vadd.f32 %v1583_v59, %v1582_v26 }
 0xc7f   : > { %2222 = vpush %v1584_v9 }
 0xcb0   : > { %s2223_s18 = spop %2222 }
 0xcb1   : > { %v1586_v55 = vstv %s2223_s18 }
 0xcb2   : > { %v1587_v4 = vmul.f32 0.00048828125, %v1586_v55 }
 0xcb4   : > { %v1588_v34 = vadd.f32 1e-05, %v1587_v4 }
 0xcb6   : > { %2265 = vrsqrt.f32 %v1588_v34 }
 0xcc0   : > { %v2266_v40 = vpop.eup %2265 }
 0xcc1   : > { %v1590_v14 = vmul.f32 %v2266_v40, %v3104_v37 }
 0xcc3   : > { %1599 = vperm.xlu0 %2255, %v1590_v14   ;;  %v1591_v20 = vmul.f32 %v1590_v14, %v1571_v53 }
 0xcc5   : > { %1593 = vrot.lane.b32.xlu1 %v1591_v20, %s2285_s27 }
 0xcc7   : > { %2257 = vset.pattern.permute.xlu0 %v2290_v36 }
 0xd37   : > { %v1594_v57 = vpop.permute.xlu1 %1593 }
 0xd38   : > { %v1596_v50 = vsub.f32 %v3104_v37, %v1594_v57  ;;  %v3195_v37 = vld [vmem:[%s3359_s10] sm:$0xff] }
 0xd3a   : > { %1606 = vperm.xlu1 %2256, %v1596_v50  }
 0xd42   : > { %v1600_v21 = vpop.permute.xlu0 %1599 }
 0xd43   : > { %v1602_v23 = vmul.f32 %v1600_v21, %v1556_v58  ;;  %v1603_v11 = vmul.f32 %v1600_v21, %v1558_v15 }
 0xdb9   : > { %v1607_v28 = vpop.permute.xlu1 %1606 }
 0xdba   : > { %v1609_v51 = vadd.f32 %v1607_v28, %v1602_v23  ;;  %v1610_v5 = vadd.f32 %v1607_v28, %v1603_v11 }
 0xdbc   : > { %v3168_v12 = vmax.f32 %v1609_v51, 0.0  ;;  %v1612_v13 = vmax.f32 %v1610_v5, 0.0 }
 0xdbe   : > { %1639 = vrot.lane.b32.xlu0 %v3168_v12, %s2285_s27  ;;  %1615 = vrot.lane.b32.xlu1 %v3168_v12, %s2282_s23 }
 0xdc2   : > { %1647 = vrot.lane.b32.xlu0 %v3168_v12, %s2286_s29  ;;  %1617 = vrot.lane.b32.xlu1 %v1612_v13, %s2282_s23 }
 0xdc6   : > { %1655 = vrot.lane.b32.xlu0 %v3168_v12, %s2287_s30  ;;  %1623 = vrot.lane.b32.xlu1 %v3168_v12, %s2283_s24 }
 0xdca   : > { %1663 = vrot.lane.b32.xlu0 %v3168_v12, %s2288_s14  ;;  %1625 = vrot.lane.b32.xlu1 %v1612_v13, %s2283_s24 }
 0xdce   : > { %1671 = vrot.lane.b32.xlu0 %v3168_v12, %s2289_s15  ;;  %1631 = vrot.lane.b32.xlu1 %v3168_v12, %s2284_s26 }
 0xdd2   : > { %1633 = vrot.lane.b32.xlu1 %v1612_v13, %s2284_s26  ;;  %1681 = vperm.xlu0 %2257, %v3195_v37  }
 0xdd6   : > { %1641 = vrot.lane.b32.xlu1 %v1612_v13, %s2285_s27  ;;  %2258 = vset.pattern.permute.xlu0 %v2291_v22 }
 0xdda   : > { %1649 = vrot.lane.b32.xlu1 %v1612_v13, %s2286_s29 }
 0xdde   : > { %1657 = vrot.lane.b32.xlu1 %v1612_v13, %s2287_s30 }
 0xde2   : > { %1665 = vrot.lane.b32.xlu1 %v1612_v13, %s2288_s14 }
 0xde6   : > { %1673 = vrot.lane.b32.xlu1 %v1612_v13, %s2289_s15 }
 0xe30   : > { %v1616_v39 = vpop.permute.xlu1 %1615  ;;  %v1640_v62 = vpop.permute.xlu0 %1639 }
 0xe34   : > { %v1618_v49 = vpop.permute.xlu1 %1617  ;;  %v1648_v60 = vpop.permute.xlu0 %1647 }
 0xe35   : > { %v1619_v43 = vsel %vm661_vm1, %v1616_v39, %v1618_v49  ;;  %v1620_v15 = vsel %vm661_vm1, %v1618_v49, %v1616_v39 }
 0xe36   : > { %v1621_v22 = vmul.f32 %v1620_v15, %v2618_v63  ;;  %v1622_v24 = vmul.f32 %v1619_v43, %v2621_v1 }
 0xe38   : > { %v1624_v58 = vpop.permute.xlu1 %1623  ;;  %v1656_v9 = vpop.permute.xlu0 %1655 }
 0xe3c   : > { %v1626_v17 = vpop.permute.xlu1 %1625  ;;  %v1664_v28 = vpop.permute.xlu0 %1663 }
 0xe3d   : > { %v1627_v52 = vsel %vm706_vm2, %v1624_v58, %v1626_v17  ;;  %v1628_v42 = vsel %vm706_vm2, %v1626_v17, %v1624_v58 }
 0xe3e   : > { %v1629_v41 = vmul.f32 %v1628_v42, %v2642_v18  ;;  %v1630_v38 = vmul.f32 %v1627_v52, %v2645_v19 }
 0xe40   : > { %v2178_v2 = vpack.c.bf16 %v1629_v41, %v1621_v22  ;;  %v1632_v61 = vpop.permute.xlu1 %1631  ;;  %v2176_v53 = vpack.c.bf16 %v1630_v38, %v1622_v24  ;;  %v1672_v15 = vpop.permute.xlu0 %1671 }
 0xe42   : > { %2177 = vmatprep.subr.bf16.mxu0 %v2176_v53 }
 0xe43   : > { %2179 = vmatpush1.bf16.msra.mxu0 %v2178_v2 }
 0xe44   : > { %v1634_v45 = vpop.permute.xlu1 %1633 }
 0xe45   : > { %v1635_v3 = vsel %vm752_vm3, %v1632_v61, %v1634_v45  ;;  %v1636_v35 = vsel %vm752_vm3, %v1634_v45, %v1632_v61 }
 0xe46   : > { %v1637_v8 = vmul.f32 %v1636_v35, %v2680_v29  ;;  %v1638_v16 = vmul.f32 %v1635_v3, %v2683_v31 }
 0xe48   : > { %v1642_v54 = vpop.permute.xlu1 %1641 }
 0xe49   : > { %v1643_v44 = vsel %vm798_vm4, %v1640_v62, %v1642_v54  ;;  %v1644_v7 = vsel %vm798_vm4, %v1642_v54, %v1640_v62  ;;  %v1614_v62 = vld [vmem:[%s3358_s9] sm:$0xff] }
 0xe4a   : > { %v1645_v26 = vmul.f32 %v1644_v7, %v2722_v32  ;;  %v1646_v59 = vmul.f32 %v1643_v44, %v2725_v33 }
 0xe4c   : > { %v2182_v55 = vpack.c.bf16 %v1645_v26, %v1637_v8  ;;  %v1650_v4 = vpop.permute.xlu1 %1649  ;;  %v2180_v34 = vpack.c.bf16 %v1646_v59, %v1638_v16 }
 0xe4d   : > { %v1651_v40 = vsel %vm844_vm5, %v1648_v60, %v1650_v4  ;;  %v1652_v14 = vsel %vm844_vm5, %v1650_v4, %v1648_v60 }
 0xe4e   : > { %v1653_v20 = vmul.f32 %v1651_v40, %v2792_v30  ;;  %v1654_v57 = vmul.f32 %v1652_v14, %v2795_v25  ;;  %2181 = vmatprep.subr.bf16.mxu0 %v2180_v34 }
 0xe4f   : > { %2183 = vmatpush1.bf16.msra.mxu0 %v2182_v55 }
 0xe50   : > { %v2186_v50 = vpack.c.bf16 %v1653_v20, %v3168_v12  ;;  %v1658_v21 = vpop.permute.xlu1 %1657  ;;  %v2184_v23 = vpack.c.bf16 %v1654_v57, %v1612_v13 }
 0xe51   : > { %v1659_v11 = vsel %vm890_vm6, %v1656_v9, %v1658_v21  ;;  %v1660_v51 = vsel %vm890_vm6, %v1658_v21, %v1656_v9  ;;  %v1682_v2 = vpop.permute.xlu0 %1681 }
 0xe52   : > { %2185 = vmatprep.subr.bf16.mxu0 %v2184_v23  ;;  %v1661_v12 = vmul.f32 %v1659_v11, %v2822_v46  ;;  %v1662_v13 = vmul.f32 %v1660_v51, %v2825_v47 }
 0xe53   : > { %2187 = vmatpush1.bf16.msra.mxu0 %v2186_v50 }
 0xe54   : > { %v1666_v5 = vpop.permute.xlu1 %1665 }
 0xe55   : > { %v1667_v39 = vsel %vm936_vm7, %v1664_v28, %v1666_v5  ;;  %v1668_v49 = vsel %vm936_vm7, %v1666_v5, %v1664_v28 }
 0xe56   : > { %v1669_v58 = vmul.f32 %v1667_v39, %v2864_v10  ;;  %v1670_v43 = vmul.f32 %v1668_v49, %v2867_v27 }
 0xe58   : > { %v2190_v17 = vpack.c.bf16 %v1669_v58, %v1661_v12  ;;  %v1674_v52 = vpop.permute.xlu1 %1673  ;;  %v2188_v42 = vpack.c.bf16 %v1670_v43, %v1662_v13 }
 0xe59   : > { %v1676_v22 = vsel %vm982_vm8, %v1674_v52, %v1672_v15  ;;  %v1675_v24 = vsel %vm982_vm8, %v1672_v15, %v1674_v52 }
 0xe5a   : > { %v1678_v41 = vmul.f32 %v1676_v22, %v2909_v48  ;;  %2189 = vmatprep.subr.bf16.mxu0 %v2188_v42  ;;  %v1677_v38 = vmul.f32 %v1675_v24, %v2906_v6 }
 0xe5b   : > { %2191 = vmatpush1.bf16.msra.mxu0 %v2190_v17 }
 0xe5c   : > { %1703 = vmatprep.subr.mxu0 %v1678_v41 }
 0xe5f   : > { %1704 = vmatpush1.msra.mxu0 %v1677_v38 }
 0xe60   : > { %2058 = vmatmul.mubr.msk.f32.vlgmr.msra.gmra.mrb[6].mxu0 %vm1287_vm9, %v1614_v62 }
 0xe61   : > { %1949 = vmatprep.mubr.f32.mxu0 %v2281_v0 }
 0xf33   : > { %v1753_v61 = vpop.f32.mrb[6].mxu0 }
 0xf34   : > { %v1754_v53 = vadd.f32 %v1753_v61, %v1682_v2  ;;  %v1755_v45 = vpop.f32.mrb[7].mxu0 }
 0xf35   : > { %v1756_v60 = vadd.f32 %v1755_v45, %v1682_v2 }
 0xf37   : > { %v1758_v3 = vadd.f32 %v1756_v60, %v1754_v53 }
 0xf39   : > { %1759 = vadd.xlane.f32.xlu1 %v1758_v3 }
 0xfc6   : > { %v1760_v35 = vpop.xlane.xlu1 %1759 }
 0xfc7   : > { %v1761_v54 = vrot.slane %v1760_v35, 4 }
 0xfc9   : > { %v1762_v44 = vadd.f32 %v1761_v54, %v1760_v35 }
 0xfcb   : > { %v1763_v7 = vrot.slane %v1762_v44, 2 }
 0xfcd   : > { %v1764_v8 = vadd.f32 %v1763_v7, %v1762_v44 }
 0xfcf   : > { %v1765_v16 = vrot.slane %v1764_v8, 1 }
 0xfd1   : > { %v1766_v26 = vadd.f32 %v1765_v16, %v1764_v8 }
 0xfd3   : > { %2224 = vpush %v1766_v26 }
0x1004   : > { %s2225_s16 = spop %2224 }
0x1005   : > { %v1768_v59 = vstv %s2225_s16 }
0x1006   : > { %v1769_v9 = vmul.f32 0.00048828125, %v1768_v59 }
0x1008   : > { %v1770_v55 = vsub.f32 %v1754_v53, %v1769_v9  ;;  %v1771_v0 = vsub.f32 %v1756_v60, %v1769_v9 }
0x100a   : > { %v1772_v4 = vmul.f32 %v1770_v55, %v1770_v55  ;;  %v1773_v34 = vmul.f32 %v1771_v0, %v1771_v0 }
0x100c   : > { %v1774_v40 = vadd.f32 %v1773_v34, %v1772_v4 }
0x100e   : > { %1775 = vadd.xlane.f32.xlu0 %v1774_v40 }
0x109b   : > { %v1776_v14 = vpop.xlane.xlu0 %1775 }
0x109c   : > { %v1777_v20 = vrot.slane %v1776_v14, 4 }
0x109e   : > { %v1778_v57 = vadd.f32 %v1777_v20, %v1776_v14 }
0x10a0   : > { %v1779_v50 = vrot.slane %v1778_v57, 2 }
0x10a2   : > { %v1780_v21 = vadd.f32 %v1779_v50, %v1778_v57 }
0x10a4   : > { %v1781_v23 = vrot.slane %v1780_v21, 1 }
0x10a6   : > { %v1782_v28 = vadd.f32 %v1781_v23, %v1780_v21 }
0x10a8   : > { %2226 = vpush %v1782_v28 }
0x10d9   : > { %s2227_s17 = spop %2226 }
0x10da   : > { %v1784_v11 = vstv %s2227_s17 }
0x10db   : > { %v1785_v51 = vmul.f32 0.00048828125, %v1784_v11 }
0x10dd   : > { %v1786_v5 = vadd.f32 1e-05, %v1785_v51 }
0x10df   : > { %2267 = vrsqrt.f32 %v1786_v5 }
0x10e9   : > { %v2268_v39 = vpop.eup %2267 }
0x10ea   : > { %v1788_v49 = vmul.f32 %v2268_v39, %v3195_v37 }
0x10ec   : > { %1797 = vperm.xlu0 %2258, %v1788_v49   ;;  %v1789_v12 = vmul.f32 %v1788_v49, %v1769_v9 }
0x10ee   : > { %1791 = vrot.lane.b32.xlu1 %v1789_v12, %s2285_s27 }
0x10f0   : > { %2260 = vset.pattern.permute.xlu0 %v2290_v36 }
0x1160   : > { %v1792_v13 = vpop.permute.xlu1 %1791 }
0x1161   : > { %v1794_v58 = vsub.f32 %v3195_v37, %v1792_v13 }
0x1163   : > { %1804 = vperm.xlu1 %2256, %v1794_v58  }
0x1167   : > { %2259 = vset.pattern.permute.xlu1 %v2290_v36  ;;  %v1876_v36 = vld [vmem:[%s3361_s12] sm:$0xf] }
0x116b   : > { %v1798_v43 = vpop.permute.xlu0 %1797 }
0x116c   : > { %v1800_v15 = vmul.f32 %v1798_v43, %v1754_v53  ;;  %v1801_v17 = vmul.f32 %v1798_v43, %v1756_v60 }
0x11e2   : > { %v1805_v52 = vpop.permute.xlu1 %1804 }
0x11e3   : > { %v1807_v42 = vadd.f32 %v1805_v52, %v1800_v15  ;;  %v1808_v22 = vadd.f32 %v1805_v52, %v1801_v17 }
0x11e5   : > { %v3260_v24 = vmax.f32 %v1807_v42, 0.0  ;;  %v1810_v41 = vmax.f32 %v1808_v22, 0.0 }
0x11e7   : > { %1838 = vrot.lane.b32.xlu0 %v1810_v41, %s2285_s27  ;;  %1812 = vrot.lane.b32.xlu1 %v3260_v24, %s2282_s23 }
0x11eb   : > { %1846 = vrot.lane.b32.xlu0 %v1810_v41, %s2286_s29  ;;  %1814 = vrot.lane.b32.xlu1 %v1810_v41, %s2282_s23 }
0x11ef   : > { %1854 = vrot.lane.b32.xlu0 %v1810_v41, %s2287_s30  ;;  %1820 = vrot.lane.b32.xlu1 %v3260_v24, %s2283_s24 }
0x11f3   : > { %1862 = vrot.lane.b32.xlu0 %v1810_v41, %s2288_s14  ;;  %1822 = vrot.lane.b32.xlu1 %v1810_v41, %s2283_s24 }
0x11f7   : > { %1870 = vrot.lane.b32.xlu0 %v1810_v41, %s2289_s15  ;;  %1828 = vrot.lane.b32.xlu1 %v3260_v24, %s2284_s26 }
0x11fb   : > { %1830 = vrot.lane.b32.xlu1 %v1810_v41, %s2284_s26 }
0x11ff   : > { %1836 = vrot.lane.b32.xlu1 %v3260_v24, %s2285_s27 }
0x1203   : > { %1844 = vrot.lane.b32.xlu1 %v3260_v24, %s2286_s29  ;;  %s2063_s29 = sshll.u32 %s2372_s28, 3 }
0x1207   : > { %1852 = vrot.lane.b32.xlu1 %v3260_v24, %s2287_s30 }
0x120b   : > { %1860 = vrot.lane.b32.xlu1 %v3260_v24, %s2288_s14 }
0x120f   : > { %1868 = vrot.lane.b32.xlu1 %v3260_v24, %s2289_s15  ;;  %s538_s15 = scalar_lea.vmem %s3362_s13, %s2063_s29 }
0x1213   : > { %1879 = vperm.xlu1 %2259, %v1876_v36  }
0x1259   : > { %v1813_v37 = vpop.permute.xlu1 %1812  ;;  %v1839_v7 = vpop.permute.xlu0 %1838 }
0x125d   : > { %v1815_v38 = vpop.permute.xlu1 %1814  ;;  %v1847_v9 = vpop.permute.xlu0 %1846 }
0x125e   : > { %v1816_v2 = vsel %vm661_vm1, %v1813_v37, %v1815_v38  ;;  %v1817_v61 = vsel %vm661_vm1, %v1815_v38, %v1813_v37 }
0x125f   : > { %v1818_v3 = vmul.f32 %v1817_v61, %v2618_v63  ;;  %v1819_v35 = vmul.f32 %v1816_v2, %v2621_v1 }
0x1261   : > { %v1821_v62 = vpop.permute.xlu1 %1820  ;;  %v1855_v14 = vpop.permute.xlu0 %1854 }
0x1265   : > { %v1823_v53 = vpop.permute.xlu1 %1822  ;;  %v1863_v11 = vpop.permute.xlu0 %1862 }
0x1266   : > { %v1824_v45 = vsel %vm706_vm2, %v1821_v62, %v1823_v53  ;;  %v1825_v60 = vsel %vm706_vm2, %v1823_v53, %v1821_v62 }
0x1267   : > { %v1826_v54 = vmul.f32 %v1825_v60, %v2642_v18  ;;  %v1827_v44 = vmul.f32 %v1824_v45, %v2645_v19 }
0x1269   : > { %v2194_v8 = vpack.c.bf16 %v1826_v54, %v1818_v3  ;;  %v1829_v16 = vpop.permute.xlu1 %1828  ;;  %v2192_v26 = vpack.c.bf16 %v1827_v44, %v1819_v35  ;;  %v1871_v43 = vpop.permute.xlu0 %1870 }
0x126b   : > { %2193 = vmatprep.subr.bf16.mxu0 %v2192_v26 }
0x126c   : > { %2195 = vmatpush1.bf16.msra.mxu0 %v2194_v8 }
0x126d   : > { %v1831_v59 = vpop.permute.xlu1 %1830 }
0x126e   : > { %v1832_v55 = vsel %vm752_vm3, %v1829_v16, %v1831_v59  ;;  %v1833_v63 = vsel %vm752_vm3, %v1831_v59, %v1829_v16 }
0x126f   : > { %v1834_v19 = vmul.f32 %v1833_v63, %v2680_v29  ;;  %v1835_v4 = vmul.f32 %v1832_v55, %v2683_v31 }
0x1271   : > { %v1837_v0 = vpop.permute.xlu1 %1836 }
0x1272   : > { %v1840_v1 = vsel %vm798_vm4, %v1837_v0, %v1839_v7  ;;  %v1841_v18 = vsel %vm798_vm4, %v1839_v7, %v1837_v0 }
0x1273   : > { %v1842_v34 = vmul.f32 %v1841_v18, %v2722_v32  ;;  %v1843_v40 = vmul.f32 %v1840_v1, %v2725_v33 }
0x1275   : > { %v2198_v20 = vpack.c.bf16 %v1842_v34, %v1834_v19  ;;  %v1845_v57 = vpop.permute.xlu1 %1844  ;;  %v2196_v50 = vpack.c.bf16 %v1843_v40, %v1835_v4 }
0x1276   : > { %v1848_v21 = vsel %vm844_vm5, %v1845_v57, %v1847_v9  ;;  %v1849_v23 = vsel %vm844_vm5, %v1847_v9, %v1845_v57 }
0x1277   : > { %v1850_v28 = vmul.f32 %v1848_v21, %v2792_v30  ;;  %v1851_v29 = vmul.f32 %v1849_v23, %v2795_v25  ;;  %2197 = vmatprep.subr.bf16.mxu0 %v2196_v50 }
0x1278   : > { %2199 = vmatpush1.bf16.msra.mxu0 %v2198_v20 }
0x1279   : > { %v2202_v31 = vpack.c.bf16 %v1850_v28, %v3260_v24  ;;  %v1853_v32 = vpop.permute.xlu1 %1852  ;;  %v2200_v33 = vpack.c.bf16 %v1851_v29, %v1810_v41 }
0x127a   : > { %v1856_v51 = vsel %vm890_vm6, %v1853_v32, %v1855_v14  ;;  %v1857_v5 = vsel %vm890_vm6, %v1855_v14, %v1853_v32 }
0x127b   : > { %2201 = vmatprep.subr.bf16.mxu0 %v2200_v33  ;;  %v1858_v49 = vmul.f32 %v1856_v51, %v2822_v46  ;;  %v1859_v12 = vmul.f32 %v1857_v5, %v2825_v47  ;;  %v1811_v47 = vld [vmem:[%s3360_s11] sm:$0xf] }
0x127c   : > { %2203 = vmatpush1.bf16.msra.mxu0 %v2202_v31 }
0x127d   : > { %v1861_v39 = vpop.permute.xlu1 %1860 }
0x127e   : > { %v1864_v30 = vsel %vm936_vm7, %v1861_v39, %v1863_v11  ;;  %v1865_v25 = vsel %vm936_vm7, %v1863_v11, %v1861_v39 }
0x127f   : > { %v1866_v13 = vmul.f32 %v1864_v30, %v2864_v10  ;;  %v1867_v58 = vmul.f32 %v1865_v25, %v2867_v27 }
0x1281   : > { %v2206_v15 = vpack.c.bf16 %v1866_v13, %v1858_v49  ;;  %v1869_v17 = vpop.permute.xlu1 %1868  ;;  %v2204_v52 = vpack.c.bf16 %v1867_v58, %v1859_v12 }
0x1282   : > { %v1873_v42 = vsel %vm982_vm8, %v1871_v43, %v1869_v17  ;;  %v1872_v22 = vsel %vm982_vm8, %v1869_v17, %v1871_v43 }
0x1283   : > { %v1875_v24 = vmul.f32 %v1873_v42, %v2909_v48  ;;  %2205 = vmatprep.subr.bf16.mxu0 %v2204_v52  ;;  %v1874_v46 = vmul.f32 %v1872_v22, %v2906_v6 }
0x1284   : > { %2207 = vmatpush1.bf16.msra.mxu0 %v2206_v15 }
0x1285   : > { %1901 = vmatprep.subr.mxu0 %v1875_v24 }
0x1288   : > { %1902 = vmatpush1.msra.mxu0 %v1874_v46 }
0x1289   : > { %2059 = vmatmul.mubr.msk.f32.vlgmr.msra.gmra.mrb[8].mxu0 %vm1287_vm9, %v1811_v47 }
0x1292   : > { %v1880_v10 = vpop.permute.xlu1 %1879 }
0x135c   : > { %v1951_v27 = vpop.f32.mrb[8].mxu0 }
0x135d   : > { %v1953_v41 = vpop.f32.mrb[9].mxu0  ;;  %v1952_v56 = vadd.f32 %v1951_v27, %v1880_v10 }
0x135e   : > { %v1954_v36 = vadd.f32 %v1953_v41, %v1880_v10 }
0x135f   : > { %v1956_v37 = vmul.f32 1.442695, %v1952_v56 }
0x1360   : > { %v1958_v48 = vmul.f32 1.442695, %v1954_v36 }
0x1361   : > { %2269 = vpow2.f32 %v1956_v37 }
0x1362   : > { %2271 = vpow2.f32 %v1958_v48 }
0x136b   : > { %v2270_v38 = vpop.eup %2269 }
0x136c   : > { %v2272_v62 = vpop.eup %2271 }
0x136d   : > { %v1962_v6 = vcombine.low %v2270_v38, %v2272_v62 }
0x136f   : > { %1964 = vst [vmem:[%s538_s15] sm:$0xff] %v1962_v6 }
0x1370 PF: > { %s23_s25 = sadd.s32 1, %s2279_s25  }
0x1371   : > { %p20_p7 = scmp.ge.s32.totalorder %s23_s25, 6  }
0x1373   :  { %22 = sbr.rel (!%p20_p7) target bundleno = 1 (0x1), region = 112 }

</bundles_post_ra>
